<compile_context>
chip_gen: v6e
topology: v6e:2x2x1
jax: 0.10.0
libtpu: 0.0.40
codegen_flags: <defaults>
</compile_context>

<pallas_src>
import math

import jax
import jax.numpy as jnp
from jax import lax
from jax.experimental import pallas as pl
from jax.experimental.pallas import tpu as pltpu

# ---------------- model hyper-parameters (small, deterministic) -------------
NUM_USERS = 10
NUM_ITEMS = 20
EMB_DIM = 32                  # d_model (divisible by N_HEADS)
N_HEADS = 4
HEAD_DIM = EMB_DIM // N_HEADS
DFF = EMB_DIM                 # dim_feedforward == embedding_dim
PAD_IDX = NUM_ITEMS + 1       # nn.Embedding(num_items + 2, D, padding_idx=num_items+1)
VOCAB = NUM_ITEMS + 2
VOCAB_PAD = 32                # vocab rows padded; == EMB_DIM so it packs into the slab
LN_EPS = 1e-5
NEG_INF = -1e9

SEQ_LEN = 8                   # raw input sequence length S
S_REAL = SEQ_LEN              # index of the appended (padding_idx-1) token; last real pos
S_PAD = 16                    # padded seq length: power of two, multiple of 8
BATCH = 2
N_TOK = BATCH * S_PAD         # rows of the fused activation slab (== 32)

LANES = 128                   # slab lane width (one full vreg lane tile)

# ---- packed parameter slab layout: (SLAB_ROWS, 128) f32 ---------------------
R_QKV = 0        # rows 0:32   lanes [0:32]=Wq*s [32:64]=Wk [64:96]=Wv [96:128]=emb table
R_MISC = 32      # rows 32:64  lanes [0:32]=Wo [32:64]=Lin1 [64:96]=Lin2 [96:128]=FC2pad
R_FC1 = 64       # rows 64:128 lanes [0:32]=[FC1a;FC1b]
R_CBIAS = R_FC1  # rows 64:96  lanes [32:64] = constant attention-bias block
R_BIAS = 128     # rows 128:144 bias / LN / score rows
SLAB_ROWS = 144

# bias row offsets (relative to R_BIAS)
B_QKV = 0        # full 96-lane row [b_q*s | b_k | b_v]
B_O, B_LN1G, B_LN1B = 1, 2, 3
B_LIN1, B_LIN2, B_LN2G, B_LN2B = 4, 5, 6, 7
B_FC1, B_FC2, B_SCW = 8, 9, 10

# SMEM scalar indices
S_A_ENC, S_A1, S_A2, S_SC_B = 0, 1, 2, 3


def _prelu(x, a):
    # PReLU with a scalar slope `a` (SMEM scalar broadcast).
    return jnp.where(x >= 0.0, x, a * x)


def _layernorm(x, g, b):
    mu = jnp.mean(x, axis=-1, keepdims=True)
    xc = x - mu
    var = jnp.mean(xc * xc, axis=-1, keepdims=True)
    return xc * lax.rsqrt(var + LN_EPS) * g + b


# ------------------------------- Pallas kernel -------------------------------
def seq_rating_kernel(seq_col_ref, seq_row_ref, tgt_ref, p_ref, s_ref, out_ref):
    D, HD, N, B = EMB_DIM, HEAD_DIM, N_TOK, BATCH
    f32 = jnp.float32

    def brow(i):                        # (1, D) bias / LN row
        return p_ref[R_BIAS + i:R_BIAS + i + 1, 0:D]

    emb = p_ref[R_QKV:R_QKV + VOCAB_PAD, 3 * D:4 * D]             # (VOCAB_PAD, D)

    # ---- fused embedding lookup for the sequence (one-hot matmul gather) -----
    ids = seq_col_ref[...]                                        # (N, 1) int32, -1 filled
    pos = jnp.bitwise_and(lax.broadcasted_iota(jnp.int32, (N, 1), 0), S_PAD - 1)
    ids = jnp.where(ids == -1, PAD_IDX, ids)                      # torch.where(seq==-1, pad)
    ids = jnp.where(pos == S_REAL, PAD_IDX - 1, ids)              # F.pad(..., value=pad-1)
    onehot = (lax.broadcasted_iota(jnp.int32, (N, VOCAB_PAD), 1) == ids).astype(f32)
    x = jnp.dot(onehot, emb, preferred_element_type=f32)          # (N, D)

    # ---- attention bias = precomputed const structure + per-key PAD flag -----
    # (PyTorch ADDS the float 0/1 key_padding_mask to the logits; +1 on a -1e9
    #  entry from the const block is harmless.)
    rids = seq_row_ref[...]                                       # (1, N) lane-major ids
    kpos = jnp.bitwise_and(lax.broadcasted_iota(jnp.int32, (1, N), 1), S_PAD - 1)
    rids = jnp.where(rids == -1, PAD_IDX, rids)
    rids = jnp.where(kpos == S_REAL, PAD_IDX - 1, rids)
    pad_row = (rids == PAD_IDX).astype(f32)                       # (1, N)
    attn_bias = p_ref[R_CBIAS:R_CBIAS + N, D:2 * D] + pad_row     # (N, N)

    # ---- fused Q/K/V projection (scale folded into Wq / b_q at pack time) ----
    qkv = (jnp.dot(x, p_ref[R_QKV:R_QKV + D, :], preferred_element_type=f32)
           + p_ref[R_BIAS + B_QKV:R_BIAS + B_QKV + 1, :])         # (N, 128); lanes 96:128 unused

    ctx_parts = []
    for h in range(N_HEADS):                                      # tiny static unroll
        lo = h * HD
        q_h = qkv[:, lo:lo + HD]
        k_h = qkv[:, D + lo:D + lo + HD]
        v_h = qkv[:, 2 * D + lo:2 * D + lo + HD]
        sc = lax.dot_general(q_h, k_h, (((1,), (1,)), ((), ())),
                             preferred_element_type=f32)          # (N, N)
        sc = sc + attn_bias
        sc = sc - jnp.max(sc, axis=-1, keepdims=True)
        pr = jnp.exp(sc)
        pr = pr * pl.reciprocal(jnp.sum(pr, axis=-1, keepdims=True), approx=False)
        ctx_parts.append(jnp.dot(pr, v_h, preferred_element_type=f32))   # (N, HD)
    ctx = jnp.concatenate(ctx_parts, axis=-1)                     # (N, D)
    attn = jnp.dot(ctx, p_ref[R_MISC:R_MISC + D, 0:D],
                   preferred_element_type=f32) + brow(B_O)        # out_proj applied once

    # ---- post-norm encoder layer (dropout == identity in eval) ---------------
    y = _layernorm(x + attn, brow(B_LN1G), brow(B_LN1B))
    f = jnp.dot(y, p_ref[R_MISC:R_MISC + D, D:2 * D],
                preferred_element_type=f32) + brow(B_LIN1)
    f = _prelu(f, s_ref[S_A_ENC])
    f = jnp.dot(f, p_ref[R_MISC:R_MISC + D, 2 * D:3 * D],
                preferred_element_type=f32) + brow(B_LIN2)
    z = _layernorm(y + f, brow(B_LN2G), brow(B_LN2B))             # (N, D)

    # ---- hidden_state[:, -1, :] == row b*S_PAD + S_REAL (static row slices) --
    hidden = jnp.concatenate(
        [z[b * S_PAD + S_REAL:b * S_PAD + S_REAL + 1, :] for b in range(B)], axis=0)  # (B, D)

    # ---- target embedding (same fused gather) --------------------------------
    tgt = tgt_ref[...]                                            # (B, 1) int32
    tgt = jnp.where(tgt == -1, PAD_IDX, tgt)
    onehot_t = (lax.broadcasted_iota(jnp.int32, (B, VOCAB_PAD), 1) == tgt).astype(f32)
    tgt_emb = jnp.dot(onehot_t, emb, preferred_element_type=f32)  # (B, D)

    # ---- scoring MLP: fused final_fc over [hidden | target_emb] --------------
    fe = jnp.concatenate([hidden, tgt_emb], axis=-1)              # (B, 2D)
    h1 = jnp.dot(fe, p_ref[R_FC1:R_FC1 + 2 * D, 0:D],
                 preferred_element_type=f32) + brow(B_FC1)
    h1 = _prelu(h1, s_ref[S_A1])
    h2 = jnp.dot(h1, p_ref[R_MISC:R_MISC + D, 3 * D:4 * D],
                 preferred_element_type=f32) + brow(B_FC2)
    h2 = _prelu(h2, s_ref[S_A2])                                  # lanes >= D/2 are exactly 0
    score = jnp.sum(h2 * brow(B_SCW), axis=-1, keepdims=True) + s_ref[S_SC_B]   # (B, 1)
    out_ref[...] = jnp.where(jnp.isnan(score), 0.0, score)


# ------------------------------ parameter init -------------------------------
def init_params(key):
    ks = jax.random.split(key, 16)

    def rnd(k, shape, s=0.1):
        return jax.random.normal(k, shape, dtype=jnp.float32) * s

    item_emb = rnd(ks[0], (VOCAB, EMB_DIM))
    item_emb = item_emb.at[PAD_IDX].set(0.0)             # padding_idx row == 0
    return dict(
        item_emb=item_emb,
        in_proj_w=rnd(ks[1], (3 * EMB_DIM, EMB_DIM)),
        in_proj_b=rnd(ks[2], (3 * EMB_DIM,)),
        out_proj_w=rnd(ks[3], (EMB_DIM, EMB_DIM)),
        out_proj_b=rnd(ks[4], (EMB_DIM,)),
        ln1_g=jnp.ones((EMB_DIM,), jnp.float32),
        ln1_b=jnp.zeros((EMB_DIM,), jnp.float32),
        lin1_w=rnd(ks[5], (DFF, EMB_DIM)),
        lin1_b=rnd(ks[6], (DFF,)),
        lin2_w=rnd(ks[7], (EMB_DIM, DFF)),
        lin2_b=rnd(ks[8], (EMB_DIM,)),
        ln2_g=jnp.ones((EMB_DIM,), jnp.float32),
        ln2_b=jnp.zeros((EMB_DIM,), jnp.float32),
        a_enc=jnp.full((1, 1), 0.25, jnp.float32),        # PReLU default weight
        fc1_w=rnd(ks[9], (EMB_DIM, 2 * EMB_DIM)),
        fc1_b=rnd(ks[10], (EMB_DIM,)),
        fc2_w=rnd(ks[11], (EMB_DIM // 2, EMB_DIM)),
        fc2_b=rnd(ks[12], (EMB_DIM // 2,)),
        sc_w=rnd(ks[13], (1, EMB_DIM // 2)),
        sc_b=rnd(ks[14], (1,)),
        a1=jnp.full((1, 1), 0.25, jnp.float32),
        a2=jnp.full((1, 1), 0.25, jnp.float32),
    )


def pack_params(p):
    """Pack PyTorch-style params into one lane-dense f32 (144,128) slab + (4,) scalars."""
    D = EMB_DIM
    f32 = jnp.float32
    assert VOCAB_PAD == D and N_TOK <= D

    def t(w):                          # PyTorch (out, in) -> (in, out)
        return jnp.asarray(w, f32).T

    scale = 1.0 / math.sqrt(HEAD_DIM)
    wq = t(p["in_proj_w"][0:D]) * scale            # scale folded into Wq
    wk = t(p["in_proj_w"][D:2 * D])
    wv = t(p["in_proj_w"][2 * D:3 * D])
    wo = t(p["out_proj_w"])
    lin1 = t(p["lin1_w"])
    lin2 = t(p["lin2_w"])
    fc1a = t(p["fc1_w"][:, :D])                    # acts on encoder hidden state
    fc1b = t(p["fc1_w"][:, D:])                    # acts on target embedding
    fc2 = jnp.pad(t(p["fc2_w"]), ((0, 0), (0, D - D // 2)))          # (D, D)

    emb = jnp.pad(jnp.asarray(p["item_emb"], f32),
                  ((0, VOCAB_PAD - VOCAB), (0, 0)))                   # (32, 32)

    # data-independent additive attention-bias structure:
    # 0 for same-batch keys at real positions (<= S_REAL), -1e9 otherwise.
    idx = jnp.arange(N_TOK)
    same_batch = (idx[:, None] // S_PAD) == (idx[None, :] // S_PAD)
    real_key = (idx[None, :] % S_PAD) <= S_REAL
    cbias = jnp.where(same_batch & real_key, 0.0, NEG_INF).astype(f32)  # (32, 32)

    row_qkv = jnp.concatenate([wq, wk, wv, emb], axis=1)              # (32, 128)
    row_misc = jnp.concatenate([wo, lin1, lin2, fc2], axis=1)         # (32, 128)
    fc1 = jnp.concatenate([fc1a, fc1b], axis=0)                       # (64, 32)
    right = jnp.concatenate(
        [jnp.concatenate([cbias, jnp.zeros((D, 2 * D), f32)], axis=1),
         jnp.zeros((D, 3 * D), f32)], axis=0)                         # (64, 96)
    row_fc1 = jnp.concatenate([fc1, right], axis=1)                   # (64, 128)

    def row(vec):                      # 1-D -> (1, 128) zero-padded row
        v = jnp.asarray(vec, f32).reshape(1, -1)
        return jnp.pad(v, ((0, 0), (0, LANES - v.shape[1])))

    b_qkv = jnp.concatenate([jnp.asarray(p["in_proj_b"][0:D], f32) * scale,
                             jnp.asarray(p["in_proj_b"][D:2 * D], f32),
                             jnp.asarray(p["in_proj_b"][2 * D:3 * D], f32)])
    bias_rows = jnp.concatenate([
        row(b_qkv),                                # B_QKV (96 lanes)
        row(p["out_proj_b"]),                      # B_O
        row(p["ln1_g"]), row(p["ln1_b"]),          # B_LN1G, B_LN1B
        row(p["lin1_b"]), row(p["lin2_b"]),        # B_LIN1, B_LIN2
        row(p["ln2_g"]), row(p["ln2_b"]),          # B_LN2G, B_LN2B
        row(p["fc1_b"]), row(p["fc2_b"]),          # B_FC1, B_FC2
        row(p["sc_w"].reshape(-1)),                # B_SCW
        jnp.zeros((5, LANES), f32),
    ], axis=0)                                                        # (16, 128)

    slab = jnp.concatenate([row_qkv, row_misc, row_fc1, bias_rows], axis=0)
    assert slab.shape == (SLAB_ROWS, LANES)

    scal = jnp.stack([
        jnp.asarray(p["a_enc"], f32).reshape(()),
        jnp.asarray(p["a1"], f32).reshape(()),
        jnp.asarray(p["a2"], f32).reshape(()),
        jnp.asarray(p["sc_b"], f32).reshape(()),
    ])
    return slab, scal


# --------------------------------- wrapper -----------------------------------
@jax.jit
def sequence_rating_forward(param_slab, param_scalars, user_ids, input_seq, target_item):
    del user_ids  # user_embedding is unused in the PyTorch forward as well
    B, S = input_seq.shape
    assert B == BATCH and S == SEQ_LEN

    # layout plumbing only: pad the int sequence to S_PAD columns (fill -1,
    # interpreted inside the kernel) and provide both a column-major copy
    # (one-hot gather) and a lane-major copy (key-padding mask row).
    seq = jnp.pad(input_seq.astype(jnp.int32), ((0, 0), (0, S_PAD - S)),
                  constant_values=-1)
    seq_col = seq.reshape(B * S_PAD, 1)
    seq_row = seq.reshape(1, B * S_PAD)
    tgt_col = target_item.astype(jnp.int32).reshape(B, 1)

    vmem = pl.BlockSpec(memory_space=pltpu.MemorySpace.VMEM)
    smem = pl.BlockSpec(memory_space=pltpu.MemorySpace.SMEM)
    out = pl.pallas_call(
        seq_rating_kernel,
        out_shape=jax.ShapeDtypeStruct((B, 1), jnp.float32),
        in_specs=[vmem, vmem, vmem, vmem, smem],
        out_specs=vmem,
    )(seq_col, seq_row, tgt_col, param_slab, param_scalars)
    return out                                                        # (B, 1)


# ----------------------------------- main ------------------------------------
if __name__ == "__main__":
    key = jax.random.PRNGKey(0)
    pk, dk1, dk2, dk3 = jax.random.split(key, 4)
    params = init_params(pk)
    slab, scal = pack_params(params)   # packed once, reused every call

    B, S = BATCH, SEQ_LEN
    user_ids = jax.random.randint(dk1, (B,), 0, NUM_USERS)
    # include -1 entries to exercise the in-kernel padding remap path
    input_seq = jax.random.randint(dk2, (B, S), -1, NUM_ITEMS)
    target_item = jax.random.randint(dk3, (B,), 0, NUM_ITEMS)

    out = sequence_rating_forward(slab, scal, user_ids, input_seq, target_item)
    jax.block_until_ready(out)
    assert out.shape == (B, 1) and out.dtype == jnp.float32
    print("KERNEL_OK")
</pallas_src>

<mosaic_0001>
module attributes {stable_mosaic.version = 11 : i64} {
  func.func @seq_rating_kernel(%arg0: memref<32x1xi32, #tpu.memory_space<vmem>>, %arg1: memref<1x32xi32, #tpu.memory_space<vmem>>, %arg2: memref<2x1xi32, #tpu.memory_space<vmem>>, %arg3: memref<144x128xf32, #tpu.memory_space<vmem>>, %arg4: memref<4xf32, #tpu.memory_space<smem>>, %arg5: memref<2x1xf32, #tpu.memory_space<vmem>>) attributes {dimension_semantics = [], scalar_prefetch = 0 : i64, scratch_operands = 0 : i64, tpu.core_type = #tpu.core_type<tc>} {
    %c0 = arith.constant 0 : index
    %c96 = arith.constant 96 : index
    %0 = vector.load %arg3[%c0, %c96] : memref<144x128xf32, #tpu.memory_space<vmem>>, vector<32x32xf32>
    %c0_0 = arith.constant 0 : index
    %c0_1 = arith.constant 0 : index
    %1 = vector.load %arg0[%c0_0, %c0_1] : memref<32x1xi32, #tpu.memory_space<vmem>>, vector<32x1xi32>
    %2 = tpu.iota {dimensions = array<i32: 0>} : vector<32x1xi32>
    %c15_i32 = arith.constant 15 : i32
    %3 = vector.broadcast %c15_i32 : i32 to vector<32x1xi32>
    %4 = arith.andi %2, %3 : vector<32x1xi32>
    %c-1_i32 = arith.constant -1 : i32
    %5 = vector.broadcast %c-1_i32 : i32 to vector<32x1xi32>
    %6 = arith.cmpi eq, %1, %5 : vector<32x1xi32>
    %c21_i32 = arith.constant 21 : i32
    %7 = vector.broadcast %c21_i32 : i32 to vector<32x1xi32>
    %8 = arith.select %6, %7, %1 : vector<32x1xi1>, vector<32x1xi32>
    %c8_i32 = arith.constant 8 : i32
    %9 = vector.broadcast %c8_i32 : i32 to vector<32x1xi32>
    %10 = arith.cmpi eq, %4, %9 : vector<32x1xi32>
    %c20_i32 = arith.constant 20 : i32
    %11 = vector.broadcast %c20_i32 : i32 to vector<32x1xi32>
    %12 = arith.select %10, %11, %8 : vector<32x1xi1>, vector<32x1xi32>
    %13 = tpu.iota {dimensions = array<i32: 1>} : vector<32x32xi32>
    %14 = vector.broadcast %12 : vector<32x1xi32> to vector<32x32xi32>
    %15 = arith.cmpi eq, %13, %14 : vector<32x32xi32>
    %16 = arith.extui %15 : vector<32x32xi1> to vector<32x32xi32>
    %17 = arith.sitofp %16 : vector<32x32xi32> to vector<32x32xf32>
    %cst = arith.constant dense<0.000000e+00> : vector<32x32xf32>
    %18 = tpu.matmul %17, %0, %cst {dimension_numbers = #tpu.dot_dimension_numbers<[1], [0], [0], [1], [0, 0, 1, 1], [], []>} : vector<32x32xf32>, vector<32x32xf32>, vector<32x32xf32> -> vector<32x32xf32>
    %c0_2 = arith.constant 0 : index
    %c0_3 = arith.constant 0 : index
    %19 = vector.load %arg1[%c0_2, %c0_3] : memref<1x32xi32, #tpu.memory_space<vmem>>, vector<1x32xi32>
    %20 = tpu.iota {dimensions = array<i32: 1>} : vector<1x32xi32>
    %c15_i32_4 = arith.constant 15 : i32
    %21 = vector.broadcast %c15_i32_4 : i32 to vector<1x32xi32>
    %22 = arith.andi %20, %21 : vector<1x32xi32>
    %c-1_i32_5 = arith.constant -1 : i32
    %23 = vector.broadcast %c-1_i32_5 : i32 to vector<1x32xi32>
    %24 = arith.cmpi eq, %19, %23 : vector<1x32xi32>
    %c21_i32_6 = arith.constant 21 : i32
    %25 = vector.broadcast %c21_i32_6 : i32 to vector<1x32xi32>
    %26 = arith.select %24, %25, %19 : vector<1x32xi1>, vector<1x32xi32>
    %c8_i32_7 = arith.constant 8 : i32
    %27 = vector.broadcast %c8_i32_7 : i32 to vector<1x32xi32>
    %28 = arith.cmpi eq, %22, %27 : vector<1x32xi32>
    %c20_i32_8 = arith.constant 20 : i32
    %29 = vector.broadcast %c20_i32_8 : i32 to vector<1x32xi32>
    %30 = arith.select %28, %29, %26 : vector<1x32xi1>, vector<1x32xi32>
    %c21_i32_9 = arith.constant 21 : i32
    %31 = vector.broadcast %c21_i32_9 : i32 to vector<1x32xi32>
    %32 = arith.cmpi eq, %30, %31 : vector<1x32xi32>
    %33 = arith.extui %32 : vector<1x32xi1> to vector<1x32xi32>
    %34 = arith.sitofp %33 : vector<1x32xi32> to vector<1x32xf32>
    %c64 = arith.constant 64 : index
    %c32 = arith.constant 32 : index
    %35 = vector.load %arg3[%c64, %c32] : memref<144x128xf32, #tpu.memory_space<vmem>>, vector<32x32xf32>
    %36 = vector.broadcast %34 : vector<1x32xf32> to vector<32x32xf32>
    %37 = arith.addf %35, %36 : vector<32x32xf32>
    %c0_10 = arith.constant 0 : index
    %c0_11 = arith.constant 0 : index
    %38 = vector.load %arg3[%c0_10, %c0_11] : memref<144x128xf32, #tpu.memory_space<vmem>>, vector<32x128xf32>
    %cst_12 = arith.constant dense<0.000000e+00> : vector<32x128xf32>
    %39 = tpu.matmul %18, %38, %cst_12 {dimension_numbers = #tpu.dot_dimension_numbers<[1], [0], [0], [1], [0, 0, 1, 1], [], []>} : vector<32x32xf32>, vector<32x128xf32>, vector<32x128xf32> -> vector<32x128xf32>
    %c128 = arith.constant 128 : index
    %c0_13 = arith.constant 0 : index
    %40 = vector.load %arg3[%c128, %c0_13] : memref<144x128xf32, #tpu.memory_space<vmem>>, vector<1x128xf32>
    %41 = vector.broadcast %40 : vector<1x128xf32> to vector<32x128xf32>
    %42 = arith.addf %39, %41 : vector<32x128xf32>
    %43 = vector.extract_strided_slice %42 {offsets = [0, 0], sizes = [32, 8], strides = [1, 1]} : vector<32x128xf32> to vector<32x8xf32>
    %44 = vector.extract_strided_slice %42 {offsets = [0, 32], sizes = [32, 8], strides = [1, 1]} : vector<32x128xf32> to vector<32x8xf32>
    %45 = vector.extract_strided_slice %42 {offsets = [0, 64], sizes = [32, 8], strides = [1, 1]} : vector<32x128xf32> to vector<32x8xf32>
    %cst_14 = arith.constant dense<0.000000e+00> : vector<32x32xf32>
    %46 = tpu.matmul %43, %44, %cst_14 {dimension_numbers = #tpu.dot_dimension_numbers<[1], [1], [0], [0], [0, 0, 1, 0], [], []>} : vector<32x8xf32>, vector<32x8xf32>, vector<32x32xf32> -> vector<32x32xf32>
    %47 = arith.addf %46, %37 : vector<32x32xf32>
    %cst_15 = arith.constant dense<0xFF800000> : vector<32xf32>
    %48 = vector.multi_reduction <maximumf>, %47, %cst_15 [1] : vector<32x32xf32> to vector<32xf32>
    %49 = vector.shape_cast %48 : vector<32xf32> to vector<32x1xf32>
    %50 = vector.broadcast %49 : vector<32x1xf32> to vector<32x32xf32>
    %51 = arith.subf %47, %50 : vector<32x32xf32>
    %52 = math.exp %51 : vector<32x32xf32>
    %cst_16 = arith.constant dense<0.000000e+00> : vector<32xf32>
    %53 = vector.multi_reduction <add>, %52, %cst_16 [1] : vector<32x32xf32> to vector<32xf32>
    %54 = vector.shape_cast %53 : vector<32xf32> to vector<32x1xf32>
    %55 = tpu.reciprocal %54 : vector<32x1xf32> -> vector<32x1xf32>
    %56 = vector.broadcast %55 : vector<32x1xf32> to vector<32x32xf32>
    %57 = arith.mulf %52, %56 : vector<32x32xf32>
    %cst_17 = arith.constant dense<0.000000e+00> : vector<32x8xf32>
    %58 = tpu.matmul %57, %45, %cst_17 {dimension_numbers = #tpu.dot_dimension_numbers<[1], [0], [0], [1], [0, 0, 1, 1], [], []>} : vector<32x32xf32>, vector<32x8xf32>, vector<32x8xf32> -> vector<32x8xf32>
    %59 = vector.extract_strided_slice %42 {offsets = [0, 8], sizes = [32, 8], strides = [1, 1]} : vector<32x128xf32> to vector<32x8xf32>
    %60 = vector.extract_strided_slice %42 {offsets = [0, 40], sizes = [32, 8], strides = [1, 1]} : vector<32x128xf32> to vector<32x8xf32>
    %61 = vector.extract_strided_slice %42 {offsets = [0, 72], sizes = [32, 8], strides = [1, 1]} : vector<32x128xf32> to vector<32x8xf32>
    %cst_18 = arith.constant dense<0.000000e+00> : vector<32x32xf32>
    %62 = tpu.matmul %59, %60, %cst_18 {dimension_numbers = #tpu.dot_dimension_numbers<[1], [1], [0], [0], [0, 0, 1, 0], [], []>} : vector<32x8xf32>, vector<32x8xf32>, vector<32x32xf32> -> vector<32x32xf32>
    %63 = arith.addf %62, %37 : vector<32x32xf32>
    %cst_19 = arith.constant dense<0xFF800000> : vector<32xf32>
    %64 = vector.multi_reduction <maximumf>, %63, %cst_19 [1] : vector<32x32xf32> to vector<32xf32>
    %65 = vector.shape_cast %64 : vector<32xf32> to vector<32x1xf32>
    %66 = vector.broadcast %65 : vector<32x1xf32> to vector<32x32xf32>
    %67 = arith.subf %63, %66 : vector<32x32xf32>
    %68 = math.exp %67 : vector<32x32xf32>
    %cst_20 = arith.constant dense<0.000000e+00> : vector<32xf32>
    %69 = vector.multi_reduction <add>, %68, %cst_20 [1] : vector<32x32xf32> to vector<32xf32>
    %70 = vector.shape_cast %69 : vector<32xf32> to vector<32x1xf32>
    %71 = tpu.reciprocal %70 : vector<32x1xf32> -> vector<32x1xf32>
    %72 = vector.broadcast %71 : vector<32x1xf32> to vector<32x32xf32>
    %73 = arith.mulf %68, %72 : vector<32x32xf32>
    %cst_21 = arith.constant dense<0.000000e+00> : vector<32x8xf32>
    %74 = tpu.matmul %73, %61, %cst_21 {dimension_numbers = #tpu.dot_dimension_numbers<[1], [0], [0], [1], [0, 0, 1, 1], [], []>} : vector<32x32xf32>, vector<32x8xf32>, vector<32x8xf32> -> vector<32x8xf32>
    %75 = vector.extract_strided_slice %42 {offsets = [0, 16], sizes = [32, 8], strides = [1, 1]} : vector<32x128xf32> to vector<32x8xf32>
    %76 = vector.extract_strided_slice %42 {offsets = [0, 48], sizes = [32, 8], strides = [1, 1]} : vector<32x128xf32> to vector<32x8xf32>
    %77 = vector.extract_strided_slice %42 {offsets = [0, 80], sizes = [32, 8], strides = [1, 1]} : vector<32x128xf32> to vector<32x8xf32>
    %cst_22 = arith.constant dense<0.000000e+00> : vector<32x32xf32>
    %78 = tpu.matmul %75, %76, %cst_22 {dimension_numbers = #tpu.dot_dimension_numbers<[1], [1], [0], [0], [0, 0, 1, 0], [], []>} : vector<32x8xf32>, vector<32x8xf32>, vector<32x32xf32> -> vector<32x32xf32>
    %79 = arith.addf %78, %37 : vector<32x32xf32>
    %cst_23 = arith.constant dense<0xFF800000> : vector<32xf32>
    %80 = vector.multi_reduction <maximumf>, %79, %cst_23 [1] : vector<32x32xf32> to vector<32xf32>
    %81 = vector.shape_cast %80 : vector<32xf32> to vector<32x1xf32>
    %82 = vector.broadcast %81 : vector<32x1xf32> to vector<32x32xf32>
    %83 = arith.subf %79, %82 : vector<32x32xf32>
    %84 = math.exp %83 : vector<32x32xf32>
    %cst_24 = arith.constant dense<0.000000e+00> : vector<32xf32>
    %85 = vector.multi_reduction <add>, %84, %cst_24 [1] : vector<32x32xf32> to vector<32xf32>
    %86 = vector.shape_cast %85 : vector<32xf32> to vector<32x1xf32>
    %87 = tpu.reciprocal %86 : vector<32x1xf32> -> vector<32x1xf32>
    %88 = vector.broadcast %87 : vector<32x1xf32> to vector<32x32xf32>
    %89 = arith.mulf %84, %88 : vector<32x32xf32>
    %cst_25 = arith.constant dense<0.000000e+00> : vector<32x8xf32>
    %90 = tpu.matmul %89, %77, %cst_25 {dimension_numbers = #tpu.dot_dimension_numbers<[1], [0], [0], [1], [0, 0, 1, 1], [], []>} : vector<32x32xf32>, vector<32x8xf32>, vector<32x8xf32> -> vector<32x8xf32>
    %91 = vector.extract_strided_slice %42 {offsets = [0, 24], sizes = [32, 8], strides = [1, 1]} : vector<32x128xf32> to vector<32x8xf32>
    %92 = vector.extract_strided_slice %42 {offsets = [0, 56], sizes = [32, 8], strides = [1, 1]} : vector<32x128xf32> to vector<32x8xf32>
    %93 = vector.extract_strided_slice %42 {offsets = [0, 88], sizes = [32, 8], strides = [1, 1]} : vector<32x128xf32> to vector<32x8xf32>
    %cst_26 = arith.constant dense<0.000000e+00> : vector<32x32xf32>
    %94 = tpu.matmul %91, %92, %cst_26 {dimension_numbers = #tpu.dot_dimension_numbers<[1], [1], [0], [0], [0, 0, 1, 0], [], []>} : vector<32x8xf32>, vector<32x8xf32>, vector<32x32xf32> -> vector<32x32xf32>
    %95 = arith.addf %94, %37 : vector<32x32xf32>
    %cst_27 = arith.constant dense<0xFF800000> : vector<32xf32>
    %96 = vector.multi_reduction <maximumf>, %95, %cst_27 [1] : vector<32x32xf32> to vector<32xf32>
    %97 = vector.shape_cast %96 : vector<32xf32> to vector<32x1xf32>
    %98 = vector.broadcast %97 : vector<32x1xf32> to vector<32x32xf32>
    %99 = arith.subf %95, %98 : vector<32x32xf32>
    %100 = math.exp %99 : vector<32x32xf32>
    %cst_28 = arith.constant dense<0.000000e+00> : vector<32xf32>
    %101 = vector.multi_reduction <add>, %100, %cst_28 [1] : vector<32x32xf32> to vector<32xf32>
    %102 = vector.shape_cast %101 : vector<32xf32> to vector<32x1xf32>
    %103 = tpu.reciprocal %102 : vector<32x1xf32> -> vector<32x1xf32>
    %104 = vector.broadcast %103 : vector<32x1xf32> to vector<32x32xf32>
    %105 = arith.mulf %100, %104 : vector<32x32xf32>
    %cst_29 = arith.constant dense<0.000000e+00> : vector<32x8xf32>
    %106 = tpu.matmul %105, %93, %cst_29 {dimension_numbers = #tpu.dot_dimension_numbers<[1], [0], [0], [1], [0, 0, 1, 1], [], []>} : vector<32x32xf32>, vector<32x8xf32>, vector<32x8xf32> -> vector<32x8xf32>
    %107 = tpu.concatenate %58, %74, %90, %106 in 1 : vector<32x8xf32>, vector<32x8xf32>, vector<32x8xf32>, vector<32x8xf32> -> vector<32x32xf32>
    %c32_30 = arith.constant 32 : index
    %c0_31 = arith.constant 0 : index
    %108 = vector.load %arg3[%c32_30, %c0_31] : memref<144x128xf32, #tpu.memory_space<vmem>>, vector<32x32xf32>
    %cst_32 = arith.constant dense<0.000000e+00> : vector<32x32xf32>
    %109 = tpu.matmul %107, %108, %cst_32 {dimension_numbers = #tpu.dot_dimension_numbers<[1], [0], [0], [1], [0, 0, 1, 1], [], []>} : vector<32x32xf32>, vector<32x32xf32>, vector<32x32xf32> -> vector<32x32xf32>
    %c129 = arith.constant 129 : index
    %c0_33 = arith.constant 0 : index
    %110 = vector.load %arg3[%c129, %c0_33] : memref<144x128xf32, #tpu.memory_space<vmem>>, vector<1x32xf32>
    %111 = vector.broadcast %110 : vector<1x32xf32> to vector<32x32xf32>
    %112 = arith.addf %109, %111 : vector<32x32xf32>
    %113 = arith.addf %18, %112 : vector<32x32xf32>
    %c130 = arith.constant 130 : index
    %c0_34 = arith.constant 0 : index
    %114 = vector.load %arg3[%c130, %c0_34] : memref<144x128xf32, #tpu.memory_space<vmem>>, vector<1x32xf32>
    %c131 = arith.constant 131 : index
    %c0_35 = arith.constant 0 : index
    %115 = vector.load %arg3[%c131, %c0_35] : memref<144x128xf32, #tpu.memory_space<vmem>>, vector<1x32xf32>
    %cst_36 = arith.constant dense<0.000000e+00> : vector<32xf32>
    %116 = vector.multi_reduction <add>, %113, %cst_36 [1] : vector<32x32xf32> to vector<32xf32>
    %117 = vector.shape_cast %116 : vector<32xf32> to vector<32x1xf32>
    %cst_37 = arith.constant 3.200000e+01 : f32
    %118 = vector.broadcast %cst_37 : f32 to vector<32x1xf32>
    %119 = arith.divf %117, %118 : vector<32x1xf32>
    %120 = vector.broadcast %119 : vector<32x1xf32> to vector<32x32xf32>
    %121 = arith.subf %113, %120 : vector<32x32xf32>
    %122 = arith.mulf %121, %121 : vector<32x32xf32>
    %cst_38 = arith.constant dense<0.000000e+00> : vector<32xf32>
    %123 = vector.multi_reduction <add>, %122, %cst_38 [1] : vector<32x32xf32> to vector<32xf32>
    %124 = vector.shape_cast %123 : vector<32xf32> to vector<32x1xf32>
    %cst_39 = arith.constant 3.200000e+01 : f32
    %125 = vector.broadcast %cst_39 : f32 to vector<32x1xf32>
    %126 = arith.divf %124, %125 : vector<32x1xf32>
    %cst_40 = arith.constant 9.99999974E-6 : f32
    %127 = vector.broadcast %cst_40 : f32 to vector<32x1xf32>
    %128 = arith.addf %126, %127 : vector<32x1xf32>
    %129 = math.rsqrt %128 : vector<32x1xf32>
    %130 = vector.broadcast %129 : vector<32x1xf32> to vector<32x32xf32>
    %131 = arith.mulf %121, %130 : vector<32x32xf32>
    %132 = vector.broadcast %114 : vector<1x32xf32> to vector<32x32xf32>
    %133 = arith.mulf %131, %132 : vector<32x32xf32>
    %134 = vector.broadcast %115 : vector<1x32xf32> to vector<32x32xf32>
    %135 = arith.addf %133, %134 : vector<32x32xf32>
    %c32_41 = arith.constant 32 : index
    %c32_42 = arith.constant 32 : index
    %136 = vector.load %arg3[%c32_41, %c32_42] : memref<144x128xf32, #tpu.memory_space<vmem>>, vector<32x32xf32>
    %cst_43 = arith.constant dense<0.000000e+00> : vector<32x32xf32>
    %137 = tpu.matmul %135, %136, %cst_43 {dimension_numbers = #tpu.dot_dimension_numbers<[1], [0], [0], [1], [0, 0, 1, 1], [], []>} : vector<32x32xf32>, vector<32x32xf32>, vector<32x32xf32> -> vector<32x32xf32>
    %c132 = arith.constant 132 : index
    %c0_44 = arith.constant 0 : index
    %138 = vector.load %arg3[%c132, %c0_44] : memref<144x128xf32, #tpu.memory_space<vmem>>, vector<1x32xf32>
    %139 = vector.broadcast %138 : vector<1x32xf32> to vector<32x32xf32>
    %140 = arith.addf %137, %139 : vector<32x32xf32>
    %c0_45 = arith.constant 0 : index
    %141 = memref.load %arg4[%c0_45] : memref<4xf32, #tpu.memory_space<smem>>
    %cst_46 = arith.constant 0.000000e+00 : f32
    %142 = vector.broadcast %cst_46 : f32 to vector<32x32xf32>
    %143 = arith.cmpf oge, %140, %142 : vector<32x32xf32>
    %144 = vector.broadcast %141 : f32 to vector<32x32xf32>
    %145 = arith.mulf %144, %140 : vector<32x32xf32>
    %146 = arith.select %143, %140, %145 : vector<32x32xi1>, vector<32x32xf32>
    %c32_47 = arith.constant 32 : index
    %c64_48 = arith.constant 64 : index
    %147 = vector.load %arg3[%c32_47, %c64_48] : memref<144x128xf32, #tpu.memory_space<vmem>>, vector<32x32xf32>
    %cst_49 = arith.constant dense<0.000000e+00> : vector<32x32xf32>
    %148 = tpu.matmul %146, %147, %cst_49 {dimension_numbers = #tpu.dot_dimension_numbers<[1], [0], [0], [1], [0, 0, 1, 1], [], []>} : vector<32x32xf32>, vector<32x32xf32>, vector<32x32xf32> -> vector<32x32xf32>
    %c133 = arith.constant 133 : index
    %c0_50 = arith.constant 0 : index
    %149 = vector.load %arg3[%c133, %c0_50] : memref<144x128xf32, #tpu.memory_space<vmem>>, vector<1x32xf32>
    %150 = vector.broadcast %149 : vector<1x32xf32> to vector<32x32xf32>
    %151 = arith.addf %148, %150 : vector<32x32xf32>
    %152 = arith.addf %135, %151 : vector<32x32xf32>
    %c134 = arith.constant 134 : index
    %c0_51 = arith.constant 0 : index
    %153 = vector.load %arg3[%c134, %c0_51] : memref<144x128xf32, #tpu.memory_space<vmem>>, vector<1x32xf32>
    %c135 = arith.constant 135 : index
    %c0_52 = arith.constant 0 : index
    %154 = vector.load %arg3[%c135, %c0_52] : memref<144x128xf32, #tpu.memory_space<vmem>>, vector<1x32xf32>
    %cst_53 = arith.constant dense<0.000000e+00> : vector<32xf32>
    %155 = vector.multi_reduction <add>, %152, %cst_53 [1] : vector<32x32xf32> to vector<32xf32>
    %156 = vector.shape_cast %155 : vector<32xf32> to vector<32x1xf32>
    %cst_54 = arith.constant 3.200000e+01 : f32
    %157 = vector.broadcast %cst_54 : f32 to vector<32x1xf32>
    %158 = arith.divf %156, %157 : vector<32x1xf32>
    %159 = vector.broadcast %158 : vector<32x1xf32> to vector<32x32xf32>
    %160 = arith.subf %152, %159 : vector<32x32xf32>
    %161 = arith.mulf %160, %160 : vector<32x32xf32>
    %cst_55 = arith.constant dense<0.000000e+00> : vector<32xf32>
    %162 = vector.multi_reduction <add>, %161, %cst_55 [1] : vector<32x32xf32> to vector<32xf32>
    %163 = vector.shape_cast %162 : vector<32xf32> to vector<32x1xf32>
    %cst_56 = arith.constant 3.200000e+01 : f32
    %164 = vector.broadcast %cst_56 : f32 to vector<32x1xf32>
    %165 = arith.divf %163, %164 : vector<32x1xf32>
    %cst_57 = arith.constant 9.99999974E-6 : f32
    %166 = vector.broadcast %cst_57 : f32 to vector<32x1xf32>
    %167 = arith.addf %165, %166 : vector<32x1xf32>
    %168 = math.rsqrt %167 : vector<32x1xf32>
    %169 = vector.broadcast %168 : vector<32x1xf32> to vector<32x32xf32>
    %170 = arith.mulf %160, %169 : vector<32x32xf32>
    %171 = vector.broadcast %153 : vector<1x32xf32> to vector<32x32xf32>
    %172 = arith.mulf %170, %171 : vector<32x32xf32>
    %173 = vector.broadcast %154 : vector<1x32xf32> to vector<32x32xf32>
    %174 = arith.addf %172, %173 : vector<32x32xf32>
    %175 = vector.extract_strided_slice %174 {offsets = [8, 0], sizes = [1, 32], strides = [1, 1]} : vector<32x32xf32> to vector<1x32xf32>
    %176 = vector.extract_strided_slice %174 {offsets = [24, 0], sizes = [1, 32], strides = [1, 1]} : vector<32x32xf32> to vector<1x32xf32>
    %177 = tpu.concatenate %175, %176 in 0 : vector<1x32xf32>, vector<1x32xf32> -> vector<2x32xf32>
    %c0_58 = arith.constant 0 : index
    %c0_59 = arith.constant 0 : index
    %178 = vector.load %arg2[%c0_58, %c0_59] : memref<2x1xi32, #tpu.memory_space<vmem>>, vector<2x1xi32>
    %c-1_i32_60 = arith.constant -1 : i32
    %179 = vector.broadcast %c-1_i32_60 : i32 to vector<2x1xi32>
    %180 = arith.cmpi eq, %178, %179 : vector<2x1xi32>
    %c21_i32_61 = arith.constant 21 : i32
    %181 = vector.broadcast %c21_i32_61 : i32 to vector<2x1xi32>
    %182 = arith.select %180, %181, %178 : vector<2x1xi1>, vector<2x1xi32>
    %183 = tpu.iota {dimensions = array<i32: 1>} : vector<2x32xi32>
    %184 = vector.broadcast %182 : vector<2x1xi32> to vector<2x32xi32>
    %185 = arith.cmpi eq, %183, %184 : vector<2x32xi32>
    %186 = arith.extui %185 : vector<2x32xi1> to vector<2x32xi32>
    %187 = arith.sitofp %186 : vector<2x32xi32> to vector<2x32xf32>
    %cst_62 = arith.constant dense<0.000000e+00> : vector<2x32xf32>
    %188 = tpu.matmul %187, %0, %cst_62 {dimension_numbers = #tpu.dot_dimension_numbers<[1], [0], [0], [1], [0, 0, 1, 1], [], []>} : vector<2x32xf32>, vector<32x32xf32>, vector<2x32xf32> -> vector<2x32xf32>
    %189 = tpu.concatenate %177, %188 in 1 : vector<2x32xf32>, vector<2x32xf32> -> vector<2x64xf32>
    %c64_63 = arith.constant 64 : index
    %c0_64 = arith.constant 0 : index
    %190 = vector.load %arg3[%c64_63, %c0_64] : memref<144x128xf32, #tpu.memory_space<vmem>>, vector<64x32xf32>
    %cst_65 = arith.constant dense<0.000000e+00> : vector<2x32xf32>
    %191 = tpu.matmul %189, %190, %cst_65 {dimension_numbers = #tpu.dot_dimension_numbers<[1], [0], [0], [1], [0, 0, 1, 1], [], []>} : vector<2x64xf32>, vector<64x32xf32>, vector<2x32xf32> -> vector<2x32xf32>
    %c136 = arith.constant 136 : index
    %c0_66 = arith.constant 0 : index
    %192 = vector.load %arg3[%c136, %c0_66] : memref<144x128xf32, #tpu.memory_space<vmem>>, vector<1x32xf32>
    %193 = vector.broadcast %192 : vector<1x32xf32> to vector<2x32xf32>
    %194 = arith.addf %191, %193 : vector<2x32xf32>
    %c1 = arith.constant 1 : index
    %195 = memref.load %arg4[%c1] : memref<4xf32, #tpu.memory_space<smem>>
    %cst_67 = arith.constant 0.000000e+00 : f32
    %196 = vector.broadcast %cst_67 : f32 to vector<2x32xf32>
    %197 = arith.cmpf oge, %194, %196 : vector<2x32xf32>
    %198 = vector.broadcast %195 : f32 to vector<2x32xf32>
    %199 = arith.mulf %198, %194 : vector<2x32xf32>
    %200 = arith.select %197, %194, %199 : vector<2x32xi1>, vector<2x32xf32>
    %c32_68 = arith.constant 32 : index
    %c96_69 = arith.constant 96 : index
    %201 = vector.load %arg3[%c32_68, %c96_69] : memref<144x128xf32, #tpu.memory_space<vmem>>, vector<32x32xf32>
    %cst_70 = arith.constant dense<0.000000e+00> : vector<2x32xf32>
    %202 = tpu.matmul %200, %201, %cst_70 {dimension_numbers = #tpu.dot_dimension_numbers<[1], [0], [0], [1], [0, 0, 1, 1], [], []>} : vector<2x32xf32>, vector<32x32xf32>, vector<2x32xf32> -> vector<2x32xf32>
    %c137 = arith.constant 137 : index
    %c0_71 = arith.constant 0 : index
    %203 = vector.load %arg3[%c137, %c0_71] : memref<144x128xf32, #tpu.memory_space<vmem>>, vector<1x32xf32>
    %204 = vector.broadcast %203 : vector<1x32xf32> to vector<2x32xf32>
    %205 = arith.addf %202, %204 : vector<2x32xf32>
    %c2 = arith.constant 2 : index
    %206 = memref.load %arg4[%c2] : memref<4xf32, #tpu.memory_space<smem>>
    %cst_72 = arith.constant 0.000000e+00 : f32
    %207 = vector.broadcast %cst_72 : f32 to vector<2x32xf32>
    %208 = arith.cmpf oge, %205, %207 : vector<2x32xf32>
    %209 = vector.broadcast %206 : f32 to vector<2x32xf32>
    %210 = arith.mulf %209, %205 : vector<2x32xf32>
    %211 = arith.select %208, %205, %210 : vector<2x32xi1>, vector<2x32xf32>
    %c138 = arith.constant 138 : index
    %c0_73 = arith.constant 0 : index
    %212 = vector.load %arg3[%c138, %c0_73] : memref<144x128xf32, #tpu.memory_space<vmem>>, vector<1x32xf32>
    %213 = vector.broadcast %212 : vector<1x32xf32> to vector<2x32xf32>
    %214 = arith.mulf %211, %213 : vector<2x32xf32>
    %cst_74 = arith.constant dense<0.000000e+00> : vector<2xf32>
    %215 = vector.multi_reduction <add>, %214, %cst_74 [1] : vector<2x32xf32> to vector<2xf32>
    %216 = vector.shape_cast %215 : vector<2xf32> to vector<2x1xf32>
    %c3 = arith.constant 3 : index
    %217 = memref.load %arg4[%c3] : memref<4xf32, #tpu.memory_space<smem>>
    %218 = vector.broadcast %217 : f32 to vector<2x1xf32>
    %219 = arith.addf %216, %218 : vector<2x1xf32>
    %220 = arith.cmpf one, %219, %219 : vector<2x1xf32>
    %cst_75 = arith.constant 0.000000e+00 : f32
    %221 = vector.broadcast %cst_75 : f32 to vector<2x1xf32>
    %222 = arith.select %220, %221, %219 : vector<2x1xi1>, vector<2x1xf32>
    %c0_76 = arith.constant 0 : index
    %c0_77 = arith.constant 0 : index
    %223 = vector.load %arg5[%c0_76, %c0_77] : memref<2x1xf32, #tpu.memory_space<vmem>>, vector<2x1xf32>
    tpu.vector_store %arg5[%c0_76, %c0_77], %222 {strides = array<i32>} : memref<2x1xf32, #tpu.memory_space<vmem>>, vector<2x1xf32>,
    return
  }
}

</mosaic_0001>

<bundles_post_ra>
// kernel: sequence_rating_forward.1
= control target key start
LH: loop header
LB: loop body
LE: loop exit
PB: predicated region body
PF: predicated region fallthrough
CT: control target
= control target key end

     0   :  { %10 = vsyncpa [#allocation3], 0  ;;  %s3362_s0 = inlined_call_operand.vmem [shape: s32[32,1], index: 0, kind: input, shape index: {}]   ;;  %s3363_s1 = inlined_call_operand.vmem [shape: s32[1,32], index: 1, kind: input, shape index: {}]   ;;  %s3364_s2 = inlined_call_operand.vmem [shape: s32[2,1], index: 2, kind: input, shape index: {}]   ;;  %s3365_s3 = inlined_call_operand.hbm [shape: f32[144,128], index: 3, kind: input, shape index: {}]   ;;  %s3366_s4 = inlined_call_operand.vmem [shape: f32[4], index: 4, kind: input, shape index: {}]   ;;  %s3367_s5 = inlined_call_operand.vmem [shape: f32[2,1], index: 5, kind: output, shape index: {}]  }
   0x1   :  { %11 = vsyncpa [#allocation4], 0  ;;  %s2843_s18 = smov [#allocation2]   ;;  %s36_s22 = sshll.u32 %s3366_s4, 4  ;;  %s37_s22 = int_to_ptr.vmem [resolvable:$true] %s36_s22 }
   0x2   :  { %s23_s19 = sshll.u32 %s2843_s18, 4  ;;  %s24_s19 = int_to_ptr.vmem [resolvable:$true] %s23_s19 }
   0x3   :  { %s2815_s23 = scalar_lea.vmem %s24_s19, 2304  ;;  %p2820_p1 = scmp.lt.s32.totalorder %s24_s19, %s24_s19 }
   0x4   :  { %p2816_p0 = scmp.ne.s32.totalorder %s24_s19, %s2815_s23  ;;  %p2821_p2 = scmp.lt.s32.totalorder %s2815_s23, %s2815_s23 }
   0x6   :  { %p2822_p3 = por %p2821_p2, %p2820_p1 }
   0x8   :  { %p2823_p4 = pnand %p2822_p3, %p2816_p0 }
   0xa   :  { %2826 = shalt.err (!%p2823_p4)
}
   0xb   :  { %s2844_s24 = smov 128   ;;  %s2845_s25 = smov 8  }
   0xc   :  { %29 = dma.hbm_to_vmem [thread:$0]  %s3365_s3, 2304, %s24_s19, [#allocation3], %s2844_s24, %s2844_s24, %s2845_s25  }
   0xd   :  { %s2827_s28 = scalar_lea.vmem %s37_s22, 16  ;;  %p2832_p6 = scmp.lt.s32.totalorder %s37_s22, %s37_s22 }
   0xe   :  { %p2828_p5 = scmp.ne.s32.totalorder %s37_s22, %s2827_s28  ;;  %p2833_p7 = scmp.lt.s32.totalorder %s2827_s28, %s2827_s28 }
  0x10   :  { %p2834_p8 = por %p2833_p7, %p2832_p6 }
  0x12   :  { %p2835_p9 = pnand %p2834_p8, %p2828_p5 }
  0x14   :  { %2838 = shalt.err (!%p2835_p9)
}
  0x15   :  { %s2846_s4 = smov [#allocation5]  }
  0x16   :  { %39 = dma.vmem_to_smem %s37_s22, 16, %s2846_s4, [#allocation4]  }
  0x17   :  { %2839 = dma.done.wait [#allocation3], 2304  }
  0x18   :  { %2840 = vsyncadd [#allocation3], 4294964992 }
  0x19   :  { %2841 = dma.done.wait [#allocation4], 16  }
  0x1a   :  { %2842 = vsyncadd [#allocation4], 4294967280 }
  0x1b   :  { %46 = sfence }
  0x1c   :  { %v51_v0 = vld [vmem:[%s3362_s0] sm:$0xff]  ;;  %v49_v1 = vld [vmem:[#allocation2 + $0x10] sm:$0xff]  ;;  %v55_v2 = vlaneseq  ;;  %v2847_v3 = vmov 0   ;;  %s2848_s3 = smov 32   ;;  %v50_v4 = vld [vmem:[#allocation2 + $0x18] sm:$0xff]  ;;  %vm122_vm6 = vcmask 261120  }
  0x1d   :  { %2729 = vset.pattern.permute.xlu0 %v2847_v3  ;;  %vm64_vm0 = vcmp.eq.s32.totalorder %v51_v0, 4294967295  ;;  %114 = vrot.lane.b32.xlu1 %v49_v1, %s2848_s3  ;;  %v52_v5 = vld [vmem:[%s3362_s0 + $0x8] sm:$0xff]  ;;  %v53_v8 = vld [vmem:[%s3362_s0 + $0x10] sm:$0xff]  ;;  %v54_v9 = vld [vmem:[%s3362_s0 + $0x18] sm:$0xff]  ;;  %v2849_v23 = vmov 0.0   ;;  %vm375_vm13 = vcmask 64512  }
  0x1e   :  { %v68_v6 = vsel %vm64_vm0, 21, %v51_v0  ;;  %2730 = vset.pattern.permute.xlu1 %v2847_v3  ;;  %v2908_v7 = vshrl.u32 %v55_v2, 7  ;;  %2499 = vmatprep.subr.mxu1 %v50_v4  ;;  %vm65_vm1 = vcmp.eq.s32.totalorder %v52_v5, 4294967295  ;;  %vm66_vm2 = vcmp.eq.s32.totalorder %v53_v8, 4294967295  ;;  %v48_v12 = vld [vmem:[#allocation2 + $0x8] sm:$0xff]  ;;  %v47_v16 = vld [vmem:[#allocation2] sm:$0xff] }
  0x1f   :  { %83 = vperm.xlu0 %2729, %v68_v6   ;;  %2500 = vmatpush3.msra.mxu1 %v50_v4  ;;  %v69_v14 = vsel %vm65_vm1, 21, %v52_v5  ;;  %vm67_vm3 = vcmp.eq.s32.totalorder %v54_v9, 4294967295  ;;  %v70_v17 = vsel %vm66_vm2, 21, %v53_v8  ;;  %v2921_v21 = vand.u32 127, %v55_v2  ;;  %v220_v39 = vld [vmem:[%s3363_s1] sm:$0x1] }
  0x20   :  { %v57_v10 = vadd.s32 8, %v2908_v7  ;;  %v59_v11 = vadd.s32 24, %v2908_v7  ;;  %2501 = vmatprep.subr.mxu1 %v49_v1  ;;  %v71_v19 = vsel %vm67_vm3, 21, %v54_v9  ;;  %vm222_vm11 = vcmp.eq.s32.totalorder %v220_v39, 4294967295  ;;  %v2280_v43 = vld [vmem:[#allocation2 + $0x80] ss:$0 sm:$0xff] }
  0x21   :  { %2502 = vmatpush3.msra.mxu1 %v49_v1  ;;  %v221_v40 = vand.u32 15, %v2921_v21  ;;  %v223_v41 = vsel %vm222_vm11, 21, %v220_v39  ;;  %s2850_s1 = smov 96   ;;  %v235_v51 = vsub.s32 0, %v2908_v7  ;;  %v230_v58 = vld [vmem:[#allocation2 + $0x48] sm:$0xff]  ;;  %v229_v59 = vld [vmem:[#allocation2 + $0x40] sm:$0xff] }
  0x22   :  { %v61_v13 = vand.u32 15, %v57_v10  ;;  %v63_v15 = vand.u32 15, %v59_v11  ;;  %2503 = vmatprep.subr.mxu1 %v48_v12  ;;  %v232_v61 = vld [vmem:[#allocation2 + $0x58] sm:$0xff]  ;;  %v231_v62 = vld [vmem:[#allocation2 + $0x50] sm:$0xff]  ;;  %s2851_s13 = smov 64   ;;  %s2852_s14 = smov 88  }
  0x23   :  { %116 = vrot.lane.b32.xlu0 %v50_v4, %s2848_s3  ;;  %2504 = vmatpush3.msra.mxu1 %v48_v12  ;;  %vm224_vm12 = vcmp.eq.s32.totalorder %v221_v40, 8  ;;  %s2853_s15 = smov 120   ;;  %s2854_s16 = smov 56   ;;  %vm1492_vm15 = vcmask 130048   ;;  %vm1497_vm0 = vcmask 195584   ;;  %vm2863_vm3 = vmmov 0  }
  0x24   :  { %vm73_vm4 = vcmp.eq.s32.totalorder %v61_v13, 8  ;;  %2505 = vmatprep.subr.mxu1 %v47_v16  ;;  %vm75_vm5 = vcmp.eq.s32.totalorder %v63_v15, 8  ;;  %v225_v45 = vsel %vm224_vm12, 20, %v223_v41  ;;  %s2855_s17 = smov 80   ;;  %s2856_s18 = smov 112  }
  0x25   :  { %v77_v18 = vsel %vm73_vm4, 20, %v69_v14  ;;  %2506 = vmatpush3.msra.mxu1 %v47_v16  ;;  %v79_v20 = vsel %vm75_vm5, 20, %v71_v19  ;;  %vm226_vm14 = vcmp.eq.s32.totalorder %v225_v45, 21  ;;  %s2857_s19 = smov 48   ;;  %s2858_s20 = smov 72  }
  0x26   :  { %86 = vperm.xlu1 %2730, %v77_v18   ;;  %v2279_v52 = vsel %vm226_vm14, 1.0, %v2849_v23  ;;  %s2859_s21 = smov 104   ;;  %s2860_s22 = smov 40   ;;  %vm2263_vm14 = vcmask 1024  }
  0x27   :  { %89 = vperm.xlu0 %2729, %v70_v17   ;;  %v236_v54 = vrot.slane %v2279_v52, %v235_v51  ;;  %s2861_s23 = smov 16   ;;  %s2862_s24 = smov 24  }
  0x28   :  { %s2356_s27 = sld [smem:[#allocation5 + $0x1]] }
  0x29   :  { %s2359_s28 = sld [smem:[#allocation5 + $0x2]] }
  0x2a   :  { %112 = vrot.lane.b32.xlu1 %v48_v12, %s2848_s3  ;;  %s2361_s4 = sld [smem:[#allocation5 + $0x3]] }
  0x2b   :  { %92 = vperm.xlu0 %2729, %v79_v20  }
  0x2e   :  { %110 = vrot.lane.b32.xlu1 %v47_v16, %s2848_s3 }
  0x8f   :  { %v2925_v25 = vpop.permute.xlu1 %114 }
  0x9a   :  { %v84_v22 = vpop.permute.xlu0 %83 }
  0x9b   :  { %vm94_vm7 = vcmp.eq.s32.totalorder %v2921_v21, %v84_v22 }
  0x9c   :  { %v2271_v24 = vsel %vm94_vm7, 1.0, %v2849_v23 }
  0x9d   :  { %2493 = vmatprep.mubr.msk.f32.mxu0 %vm122_vm6, %v2271_v24 }
  0x9e   :  { %v2928_v26 = vpop.permute.xlu0 %116 }
  0x9f   :  { %2485 = vmatprep.subr.mxu0 %v2928_v26 }
  0xa0   :  { %2486 = vmatpush3.msra.mxu0 %v2928_v26 }
  0xa1   :  { %2487 = vmatprep.subr.mxu0 %v2925_v25  ;;  %v87_v27 = vpop.permute.xlu1 %86 }
  0xa2   :  { %2488 = vmatpush3.msra.mxu0 %v2925_v25  ;;  %v90_v28 = vpop.permute.xlu0 %89  ;;  %vm95_vm8 = vcmp.eq.s32.totalorder %v2921_v21, %v87_v27 }
  0xa3   :  { %vm96_vm9 = vcmp.eq.s32.totalorder %v2921_v21, %v90_v28  ;;  %v2272_v32 = vsel %vm95_vm8, 1.0, %v2849_v23 }
  0xa4   :  { %v2273_v33 = vsel %vm96_vm9, 1.0, %v2849_v23  ;;  %vm1972_vm9 = vcmask 1040384  }
  0xa5   :  { %v2934_v29 = vpop.permute.xlu1 %112 }
  0xa6   :  { %2489 = vmatprep.subr.mxu0 %v2934_v29  ;;  %v93_v30 = vpop.permute.xlu0 %92 }
  0xa7   :  { %2490 = vmatpush3.msra.mxu0 %v2934_v29  ;;  %vm97_vm10 = vcmp.eq.s32.totalorder %v2921_v21, %v93_v30 }
  0xa8   :  { %v2274_v34 = vsel %vm97_vm10, 1.0, %v2849_v23  ;;  %vm2074_vm10 = vcmask 523264  }
  0xa9   :  { %v2940_v31 = vpop.permute.xlu1 %110 }
  0xaa   :  { %2491 = vmatprep.subr.mxu0 %v2940_v31 }
  0xab   :  { %2492 = vmatpush3.msra.mxu0 %v2940_v31 }
  0xac   :  { %2494 = vmatmul.mubr.msk.f32.vlgmr.msra.gmra.mxu0 %vm122_vm6, %v2272_v32 }
  0xad   :  { %2496 = vmatprep.mubr.msk.f32.mxu0 %vm122_vm6, %v2273_v33 }
  0xb0   :  { %2497 = vmatmul.mubr.msk.f32.gmra.mxu0 %vm122_vm6, %v2274_v34 }
 0x16c   :  { %v2951_v35 = vpop.f32.mrf.mxu0 }
 0x16e   :  { %v2953_v36 = vpop.f32.mrf.mxu0 }
 0x16f   :  { %2507 = vmatprep.mubr.msk.f32.mxu1 %vm122_vm6, %v2953_v36 }
 0x170   :  { %v2957_v37 = vpop.f32.mrf.mxu0  ;;  %2508 = vmatmul.mubr.msk.f32.vlgmr.msra.gmra.mxu1 %vm122_vm6, %v2951_v35 }
 0x172   :  { %v2961_v38 = vpop.f32.mrf.mxu0 }
 0x173   :  { %2510 = vmatprep.mubr.msk.f32.mxu1 %vm122_vm6, %v2961_v38 }
 0x174   :  { %2511 = vmatmul.mubr.msk.f32.gmra.mxu1 %vm122_vm6, %v2957_v37 }
 0x230   :  { %v2509_v42 = vpop.f32.mrf.mxu1 }
 0x231   :  { %v2983_v53 = vadd.f32 %v2509_v42, %v2280_v43 }
 0x232   :  { %v328_v44 = vpop.f32.mrf.mxu1 }
 0x233   :  { %v2971_v46 = vadd.f32 %v2280_v43, %v328_v44 }
 0x234   :  { %v2512_v47 = vpop.f32.mrf.mxu1 }
 0x235   :  { %v2973_v48 = vadd.f32 %v2512_v47, %v2280_v43  ;;  %2521 = vmatprep.mubr.msk.f32.mxu0 %vm375_vm13, %v2971_v46 }
 0x236   :  { %v338_v49 = vpop.f32.mrf.mxu1 }
 0x237   :  { %v2977_v50 = vadd.f32 %v2280_v43, %v338_v49  ;;  %357 = vrot.lane.b32.xlu0 %v2973_v48, %s2850_s1 }
 0x239   :  { %355 = vrot.lane.b32.xlu1 %v2977_v50, %s2850_s1 }
 0x23b   :  { %353 = vrot.lane.b32.xlu0 %v2983_v53, %s2850_s1 }
 0x23d   :  { %351 = vrot.lane.b32.xlu1 %v2971_v46, %s2850_s1 }
 0x23f   :  { %238 = vrot.lane.b32.xlu0 %v236_v54, %s2848_s3 }
 0x2a9   :  { %v358_v55 = vpop.permute.xlu0 %357 }
 0x2aa   :  { %2513 = vmatprep.subr.msk.mxu0 %vm375_vm13, %v358_v55 }
 0x2ab   :  { %2514 = vmatpush3.xpose.msk.msra.mxu0 %vm375_vm13, %v358_v55  ;;  %v356_v56 = vpop.permute.xlu1 %355 }
 0x2ac   :  { %2515 = vmatprep.subr.msk.mxu0 %vm375_vm13, %v356_v56 }
 0x2ad   :  { %v354_v57 = vpop.permute.xlu0 %353 }
 0x2af   :  { %2516 = vmatpush3.xpose.msk.msra.mxu0 %vm375_vm13, %v356_v56  ;;  %v352_v1 = vpop.permute.xlu1 %351 }
 0x2b0   :  { %2517 = vmatprep.subr.msk.mxu0 %vm375_vm13, %v354_v57 }
 0x2b1   :  { %v239_v60 = vpop.permute.xlu0 %238 }
 0x2b2   :  { %v242_v63 = vadd.f32 %v239_v60, %v230_v58  ;;  %v241_v0 = vadd.f32 %v239_v60, %v229_v59  ;;  %v244_v2 = vadd.f32 %v239_v60, %v232_v61  ;;  %v243_v3 = vadd.f32 %v239_v60, %v231_v62 }
 0x2b3   :  { %2518 = vmatpush3.xpose.msk.msra.mxu0 %vm375_vm13, %v354_v57 }
 0x2b4   :  { %365 = vrot.lane.b32.xlu0 %v242_v63, %s2850_s1  ;;  %363 = vrot.lane.b32.xlu1 %v241_v0, %s2850_s1 }
 0x2b5   :  { %2519 = vmatprep.subr.msk.mxu0 %vm375_vm13, %v352_v1 }
 0x2b7   :  { %2520 = vmatpush3.xpose.msk.msra.mxu0 %vm375_vm13, %v352_v1 }
 0x2b8   :  { %369 = vrot.lane.b32.xlu0 %v244_v2, %s2850_s1  ;;  %367 = vrot.lane.b32.xlu1 %v243_v3, %s2850_s1 }
 0x2ba   :  { %2522 = vmatmul.mubr.msk.f32.vlgmr.msra.gmra.mxu0 %vm375_vm13, %v2983_v53 }
 0x2bb   :  { %2524 = vmatprep.mubr.msk.f32.mxu0 %vm375_vm13, %v2977_v50 }
 0x2bc   :  { %527 = vrot.lane.b32.xlu0 %v2973_v48, %s2851_s13  ;;  %523 = vrot.lane.b32.xlu1 %v2983_v53, %s2851_s13 }
 0x2be   :  { %2525 = vmatmul.mubr.msk.f32.gmra.mxu0 %vm375_vm13, %v2973_v48 }
 0x2c0   :  { %525 = vrot.lane.b32.xlu1 %v2977_v50, %s2851_s13 }
 0x326   :  { %v3016_v4 = vpop.permute.xlu0 %365  ;;  %v3018_v5 = vpop.permute.xlu1 %363 }
 0x32a   :  { %v3020_v6 = vpop.permute.xlu0 %369  ;;  %v3022_v7 = vpop.permute.xlu1 %367 }
 0x32e   :  { %v528_v8 = vpop.permute.xlu0 %527  ;;  %v524_v9 = vpop.permute.xlu1 %523 }
 0x32f   :  { %2527 = vmatprep.subr.mxu1 %v528_v8 }
 0x330   :  { %2528 = vmatpush3.msra.mxu1 %v528_v8 }
 0x332   :  { %v526_v10 = vpop.permute.xlu1 %525 }
 0x333   :  { %2529 = vmatprep.subr.mxu1 %v526_v10 }
 0x334   :  { %2530 = vmatpush3.msra.mxu1 %v526_v10 }
 0x335   :  { %2531 = vmatprep.subr.mxu1 %v524_v9 }
 0x336   :  { %2532 = vmatpush3.msra.mxu1 %v524_v9 }
 0x37a   :  { %v2523_v11 = vpop.f32.mrf.mxu0 }
 0x37b   :  { %v464_v12 = vadd.f32 %v2523_v11, %v3016_v4 }
 0x37c   :  { %v458_v13 = vpop.f32.mrf.mxu0 }
 0x37d   :  { %v459_v14 = vadd.f32 %v458_v13, %v3018_v5  ;;  %v480_v15 = vsel %vm122_vm6, %v464_v12, -inf }
 0x37e   :  { %481 = vmax.xlane.f32.xlu0 %v480_v15  ;;  %v2526_v16 = vpop.f32.mrf.mxu0 }
 0x37f   :  { %v474_v17 = vadd.f32 %v2526_v16, %v3020_v6  ;;  %v477_v18 = vsel %vm122_vm6, %v459_v14, -inf }
 0x380   :  { %v468_v19 = vpop.f32.mrf.mxu0  ;;  %478 = vmax.xlane.f32.xlu1 %v477_v18 }
 0x381   :  { %v469_v20 = vadd.f32 %v468_v19, %v3022_v7  ;;  %v486_v24 = vsel %vm122_vm6, %v474_v17, -inf }
 0x383   :  { %v483_v22 = vsel %vm122_vm6, %v469_v20, -inf }
 0x384   :  { %484 = vmax.xlane.f32.xlu0 %v483_v22  ;;  %487 = vmax.xlane.f32.xlu1 %v486_v24 }
 0x395   :  { %644 = vrot.lane.b32.xlu1 %v2973_v48, %s2852_s14 }
 0x39a   :  { %521 = vrot.lane.b32.xlu0 %v2971_v46, %s2851_s13 }
 0x407   :  { %v482_v27 = vpop.xlane.xlu0 %481 }
 0x408   :  { %v490_v28 = vsub.f32 %v464_v12, %v482_v27 }
 0x409   :  { %v479_v30 = vpop.xlane.xlu1 %478 }
 0x40a   :  { %v495_v32 = vmul.f32 1.442695, %v490_v28  ;;  %v489_v33 = vsub.f32 %v459_v14, %v479_v30 }
 0x40c   :  { %2731 = vpow2.f32 %v495_v32  ;;  %v493_v34 = vmul.f32 1.442695, %v489_v33 }
 0x40d   :  { %v485_v39 = vpop.xlane.xlu0 %484  ;;  %v488_v40 = vpop.xlane.xlu1 %487 }
 0x40e   :  { %2733 = vpow2.f32 %v493_v34  ;;  %v492_v49 = vsub.f32 %v474_v17, %v488_v40  ;;  %v491_v51 = vsub.f32 %v469_v20, %v485_v39 }
 0x410   :  { %v499_v52 = vmul.f32 1.442695, %v492_v49  ;;  %v497_v54 = vmul.f32 1.442695, %v491_v51 }
 0x411   :  { %v522_v41 = vpop.permute.xlu0 %521  ;;  %v645_v42 = vpop.permute.xlu1 %644 }
 0x412   :  { %2533 = vmatprep.subr.mxu1 %v522_v41  ;;  %2735 = vpow2.f32 %v499_v52 }
 0x413   :  { %2534 = vmatpush3.msra.mxu1 %v522_v41  ;;  %2737 = vpow2.f32 %v497_v54 }
 0x414   :  { %2541 = vmatprep.subr.msk.mxu1 %vm375_vm13, %v645_v42 }
 0x419   :  { %v2732_v43 = vpop.eup %2731 }
 0x41a   :  { %v504_v44 = vsel %vm122_vm6, %v2732_v43, 0.0 }
 0x41b   :  { %v2734_v45 = vpop.eup %2733  ;;  %505 = vadd.xlane.f32.xlu1 %v504_v44 }
 0x41c   :  { %v501_v47 = vsel %vm122_vm6, %v2734_v45, 0.0 }
 0x41d   :  { %502 = vadd.xlane.f32.xlu0 %v501_v47 }
 0x41f   :  { %v2736_v55 = vpop.eup %2735 }
 0x420   :  { %v2738_v56 = vpop.eup %2737  ;;  %v510_v57 = vsel %vm122_vm6, %v2736_v55, 0.0 }
 0x421   :  { %v507_v58 = vsel %vm122_vm6, %v2738_v56, 0.0 }
 0x42c   :  { %640 = vrot.lane.b32.xlu1 %v2983_v53, %s2852_s14 }
 0x433   :  { %642 = vrot.lane.b32.xlu0 %v2977_v50, %s2852_s14 }
 0x450   :  { %511 = vadd.xlane.f32.xlu1 %v510_v57 }
 0x452   :  { %508 = vadd.xlane.f32.xlu0 %v507_v58 }
 0x461   :  { %630 = vrot.lane.b32.xlu1 %v2971_v46, %s2853_s15 }
 0x465   :  { %634 = vrot.lane.b32.xlu1 %v2977_v50, %s2853_s15 }
 0x468   :  { %638 = vrot.lane.b32.xlu0 %v2971_v46, %s2852_s14 }
 0x469   :  { %795 = vrot.lane.b32.xlu1 %v2977_v50, %s2854_s16 }
 0x46c   :  { %632 = vrot.lane.b32.xlu0 %v2983_v53, %s2853_s15 }
 0x46d   :  { %793 = vrot.lane.b32.xlu1 %v2983_v53, %s2854_s16 }
 0x470   :  { %636 = vrot.lane.b32.xlu0 %v2973_v48, %s2853_s15 }
 0x474   :  { %797 = vrot.lane.b32.xlu0 %v2973_v48, %s2854_s16 }
 0x4a4   :  { %v506_v59 = vpop.xlane.xlu1 %505 }
 0x4a5   :  { %2739 = vrcp.f32 %v506_v59 }
 0x4a6   :  { %v503_v60 = vpop.xlane.xlu0 %502 }
 0x4a7   :  { %2741 = vrcp.f32 %v503_v60 }
 0x4a8   :  { %v641_v2 = vpop.permute.xlu1 %640 }
 0x4aa   :  { %v643_v1 = vpop.permute.xlu0 %642 }
 0x4b2   :  { %v2740_v61 = vpop.eup %2739 }
 0x4b3   :  { %v518_v0 = vmul.f32 %v2740_v61, %v2732_v43 }
 0x4b4   :  { %v2742_v62 = vpop.eup %2741 }
 0x4b5   :  { %v517_v63 = vmul.f32 %v2742_v62, %v2734_v45 }
 0x4b7   :  { %2535 = vmatprep.mubr.msk.f32.mxu1 %vm122_vm6, %v517_v63 }
 0x4b8   :  { %2536 = vmatmul.mubr.msk.f32.vlgmr.msra.gmra.mxu1 %vm122_vm6, %v518_v0 }
 0x4b9   :  { %2542 = vmatpush3.xpose.msk.msra.mxu1 %vm375_vm13, %v645_v42 }
 0x4ba   :  { %2543 = vmatprep.subr.msk.mxu1 %vm375_vm13, %v643_v1 }
 0x4bd   :  { %2544 = vmatpush3.xpose.msk.msra.mxu1 %vm375_vm13, %v643_v1 }
 0x4be   :  { %2545 = vmatprep.subr.msk.mxu1 %vm375_vm13, %v641_v2 }
 0x4c1   :  { %2546 = vmatpush3.xpose.msk.msra.mxu1 %vm375_vm13, %v641_v2 }
 0x4d9   :  { %v512_v3 = vpop.xlane.xlu1 %511 }
 0x4da   :  { %2743 = vrcp.f32 %v512_v3 }
 0x4db   :  { %v509_v8 = vpop.xlane.xlu0 %508 }
 0x4dc   :  { %2745 = vrcp.f32 %v509_v8 }
 0x4dd   :  { %v631_v9 = vpop.permute.xlu1 %630 }
 0x4df   :  { %v639_v10 = vpop.permute.xlu0 %638 }
 0x4e0   :  { %2547 = vmatprep.subr.msk.mxu1 %vm375_vm13, %v639_v10 }
 0x4e1   :  { %2548 = vmatpush3.xpose.msk.msra.mxu1 %vm375_vm13, %v639_v10  ;;  %v635_v11 = vpop.permute.xlu1 %634 }
 0x4e3   :  { %v633_v12 = vpop.permute.xlu0 %632 }
 0x4e5   :  { %v796_v16 = vpop.permute.xlu1 %795 }
 0x4e7   :  { %v637_v13 = vpop.permute.xlu0 %636  ;;  %v2744_v14 = vpop.eup %2743 }
 0x4e8   :  { %v520_v19 = vmul.f32 %v2744_v14, %v2736_v55 }
 0x4e9   :  { %v2746_v15 = vpop.eup %2745  ;;  %v794_v20 = vpop.permute.xlu1 %793 }
 0x4ea   :  { %v519_v17 = vmul.f32 %v2746_v15, %v2738_v56 }
 0x4eb   :  { %v798_v18 = vpop.permute.xlu0 %797 }
 0x4ec   :  { %2538 = vmatprep.mubr.msk.f32.mxu1 %vm122_vm6, %v519_v17  ;;  %2555 = vmatprep.subr.mxu0 %v798_v18 }
 0x4ed   :  { %2539 = vmatmul.mubr.msk.f32.gmra.mxu1 %vm122_vm6, %v520_v19  ;;  %2556 = vmatpush3.msra.mxu0 %v798_v18 }
 0x4ee   :  { %2549 = vmatprep.mubr.msk.f32.mxu1 %vm375_vm13, %v631_v9  ;;  %2557 = vmatprep.subr.mxu0 %v796_v16 }
 0x4ef   :  { %2558 = vmatpush3.msra.mxu0 %v796_v16 }
 0x4f0   :  { %2559 = vmatprep.subr.mxu0 %v794_v20 }
 0x4f1   :  { %2550 = vmatmul.mubr.msk.f32.vlgmr.msra.gmra.mxu1 %vm375_vm13, %v633_v12  ;;  %2560 = vmatpush3.msra.mxu0 %v794_v20 }
 0x4f2   :  { %2552 = vmatprep.mubr.msk.f32.mxu1 %vm375_vm13, %v635_v11 }
 0x4f5   :  { %2553 = vmatmul.mubr.msk.f32.gmra.mxu1 %vm375_vm13, %v637_v13 }
 0x578   :  { %v3072_v22 = vpop.f32.mrf.mxu1 }
 0x57a   :  { %v3074_v24 = vpop.f32.mrf.mxu1 }
 0x5ad   :  { %v3076_v27 = vpop.f32.mrf.mxu1 }
 0x5af   :  { %v3078_v28 = vpop.f32.mrf.mxu1 }
 0x5b1   :  { %v2551_v30 = vpop.f32.mrf.mxu1 }
 0x5b2   :  { %v734_v32 = vadd.f32 %v2551_v30, %v3016_v4 }
 0x5b3   :  { %v728_v33 = vpop.f32.mrf.mxu1 }
 0x5b4   :  { %v729_v34 = vadd.f32 %v728_v33, %v3018_v5  ;;  %v750_v39 = vsel %vm122_vm6, %v734_v32, -inf }
 0x5b5   :  { %751 = vmax.xlane.f32.xlu0 %v750_v39  ;;  %v2554_v40 = vpop.f32.mrf.mxu1 }
 0x5b6   :  { %v744_v41 = vadd.f32 %v2554_v40, %v3020_v6  ;;  %v747_v42 = vsel %vm122_vm6, %v729_v34, -inf }
 0x5b7   :  { %748 = vmax.xlane.f32.xlu1 %v747_v42  ;;  %v738_v43 = vpop.f32.mrf.mxu1 }
 0x5b8   :  { %v739_v44 = vadd.f32 %v738_v43, %v3022_v7  ;;  %v756_v45 = vsel %vm122_vm6, %v744_v41, -inf }
 0x5ba   :  { %v753_v47 = vsel %vm122_vm6, %v739_v44, -inf }
 0x5bb   :  { %757 = vmax.xlane.f32.xlu1 %v756_v45  ;;  %754 = vmax.xlane.f32.xlu0 %v753_v47 }
 0x5cc   :  { %914 = vrot.lane.b32.xlu1 %v2973_v48, %s2855_s17 }
 0x5d1   :  { %791 = vrot.lane.b32.xlu0 %v2971_v46, %s2854_s16 }
 0x63e   :  { %v752_v49 = vpop.xlane.xlu0 %751 }
 0x63f   :  { %v760_v51 = vsub.f32 %v734_v32, %v752_v49 }
 0x640   :  { %v749_v52 = vpop.xlane.xlu1 %748 }
 0x641   :  { %v765_v54 = vmul.f32 1.442695, %v760_v51  ;;  %v759_v55 = vsub.f32 %v729_v34, %v749_v52 }
 0x643   :  { %2747 = vpow2.f32 %v765_v54  ;;  %v763_v56 = vmul.f32 1.442695, %v759_v55 }
 0x644   :  { %v755_v57 = vpop.xlane.xlu0 %754  ;;  %v758_v58 = vpop.xlane.xlu1 %757 }
 0x645   :  { %2749 = vpow2.f32 %v763_v56  ;;  %v762_v1 = vsub.f32 %v744_v41, %v758_v58  ;;  %v761_v2 = vsub.f32 %v739_v44, %v755_v57 }
 0x647   :  { %v769_v3 = vmul.f32 1.442695, %v762_v1  ;;  %v767_v8 = vmul.f32 1.442695, %v761_v2 }
 0x648   :  { %v792_v59 = vpop.permute.xlu0 %791  ;;  %v915_v60 = vpop.permute.xlu1 %914 }
 0x649   :  { %2561 = vmatprep.subr.mxu0 %v792_v59  ;;  %2751 = vpow2.f32 %v769_v3 }
 0x64a   :  { %2562 = vmatpush3.msra.mxu0 %v792_v59  ;;  %2753 = vpow2.f32 %v767_v8 }
 0x64b   :  { %2569 = vmatprep.subr.msk.mxu0 %vm375_vm13, %v915_v60 }
 0x650   :  { %v2748_v61 = vpop.eup %2747 }
 0x651   :  { %v774_v62 = vsel %vm122_vm6, %v2748_v61, 0.0 }
 0x652   :  { %v2750_v63 = vpop.eup %2749  ;;  %775 = vadd.xlane.f32.xlu1 %v774_v62 }
 0x653   :  { %v771_v0 = vsel %vm122_vm6, %v2750_v63, 0.0 }
 0x654   :  { %772 = vadd.xlane.f32.xlu0 %v771_v0 }
 0x656   :  { %v2752_v9 = vpop.eup %2751 }
 0x657   :  { %v2754_v10 = vpop.eup %2753  ;;  %v780_v11 = vsel %vm122_vm6, %v2752_v9, 0.0 }
 0x658   :  { %v777_v12 = vsel %vm122_vm6, %v2754_v10, 0.0 }
 0x663   :  { %910 = vrot.lane.b32.xlu1 %v2983_v53, %s2855_s17 }
 0x66a   :  { %912 = vrot.lane.b32.xlu0 %v2977_v50, %s2855_s17 }
 0x687   :  { %781 = vadd.xlane.f32.xlu1 %v780_v11 }
 0x689   :  { %778 = vadd.xlane.f32.xlu0 %v777_v12 }
 0x698   :  { %900 = vrot.lane.b32.xlu1 %v2971_v46, %s2856_s18 }
 0x69c   :  { %904 = vrot.lane.b32.xlu1 %v2977_v50, %s2856_s18 }
 0x69f   :  { %908 = vrot.lane.b32.xlu0 %v2971_v46, %s2855_s17 }
 0x6a0   :  { %1065 = vrot.lane.b32.xlu1 %v2977_v50, %s2857_s19 }
 0x6a3   :  { %902 = vrot.lane.b32.xlu0 %v2983_v53, %s2856_s18 }
 0x6a4   :  { %1063 = vrot.lane.b32.xlu1 %v2983_v53, %s2857_s19 }
 0x6a7   :  { %906 = vrot.lane.b32.xlu0 %v2973_v48, %s2856_s18 }
 0x6ab   :  { %1067 = vrot.lane.b32.xlu0 %v2973_v48, %s2857_s19 }
 0x6db   :  { %v776_v13 = vpop.xlane.xlu1 %775 }
 0x6dc   :  { %2755 = vrcp.f32 %v776_v13 }
 0x6dd   :  { %v773_v14 = vpop.xlane.xlu0 %772 }
 0x6de   :  { %2757 = vrcp.f32 %v773_v14 }
 0x6df   :  { %v911_v20 = vpop.permute.xlu1 %910 }
 0x6e1   :  { %v913_v19 = vpop.permute.xlu0 %912 }
 0x6e9   :  { %v2756_v15 = vpop.eup %2755 }
 0x6ea   :  { %v788_v18 = vmul.f32 %v2756_v15, %v2748_v61 }
 0x6eb   :  { %v2758_v16 = vpop.eup %2757 }
 0x6ec   :  { %v787_v17 = vmul.f32 %v2758_v16, %v2750_v63 }
 0x6ee   :  { %2563 = vmatprep.mubr.msk.f32.mxu0 %vm122_vm6, %v787_v17 }
 0x6ef   :  { %2564 = vmatmul.mubr.msk.f32.vlgmr.msra.gmra.mxu0 %vm122_vm6, %v788_v18 }
 0x6f0   :  { %2570 = vmatpush3.xpose.msk.msra.mxu0 %vm375_vm13, %v915_v60 }
 0x6f1   :  { %2571 = vmatprep.subr.msk.mxu0 %vm375_vm13, %v913_v19 }
 0x6f4   :  { %2572 = vmatpush3.xpose.msk.msra.mxu0 %vm375_vm13, %v913_v19 }
 0x6f5   :  { %2573 = vmatprep.subr.msk.mxu0 %vm375_vm13, %v911_v20 }
 0x6f8   :  { %2574 = vmatpush3.xpose.msk.msra.mxu0 %vm375_vm13, %v911_v20 }
 0x710   :  { %v782_v30 = vpop.xlane.xlu1 %781 }
 0x711   :  { %2759 = vrcp.f32 %v782_v30 }
 0x712   :  { %v779_v32 = vpop.xlane.xlu0 %778 }
 0x713   :  { %2761 = vrcp.f32 %v779_v32 }
 0x714   :  { %v901_v33 = vpop.permute.xlu1 %900 }
 0x716   :  { %v909_v34 = vpop.permute.xlu0 %908 }
 0x717   :  { %2575 = vmatprep.subr.msk.mxu0 %vm375_vm13, %v909_v34 }
 0x718   :  { %2576 = vmatpush3.xpose.msk.msra.mxu0 %vm375_vm13, %v909_v34  ;;  %v905_v39 = vpop.permute.xlu1 %904 }
 0x71a   :  { %v903_v40 = vpop.permute.xlu0 %902 }
 0x71c   :  { %v1066_v44 = vpop.permute.xlu1 %1065 }
 0x71e   :  { %v907_v41 = vpop.permute.xlu0 %906  ;;  %v2760_v42 = vpop.eup %2759 }
 0x71f   :  { %v790_v49 = vmul.f32 %v2760_v42, %v2752_v9 }
 0x720   :  { %v2762_v43 = vpop.eup %2761  ;;  %v1064_v51 = vpop.permute.xlu1 %1063 }
 0x721   :  { %v789_v45 = vmul.f32 %v2762_v43, %v2754_v10 }
 0x722   :  { %v1068_v47 = vpop.permute.xlu0 %1067 }
 0x723   :  { %2566 = vmatprep.mubr.msk.f32.mxu0 %vm122_vm6, %v789_v45  ;;  %2583 = vmatprep.subr.mxu1 %v1068_v47 }
 0x724   :  { %2567 = vmatmul.mubr.msk.f32.gmra.mxu0 %vm122_vm6, %v790_v49  ;;  %2584 = vmatpush3.msra.mxu1 %v1068_v47 }
 0x725   :  { %2577 = vmatprep.mubr.msk.f32.mxu0 %vm375_vm13, %v901_v33  ;;  %2585 = vmatprep.subr.mxu1 %v1066_v44 }
 0x726   :  { %2586 = vmatpush3.msra.mxu1 %v1066_v44 }
 0x727   :  { %2587 = vmatprep.subr.mxu1 %v1064_v51 }
 0x728   :  { %2578 = vmatmul.mubr.msk.f32.vlgmr.msra.gmra.mxu0 %vm375_vm13, %v903_v40  ;;  %2588 = vmatpush3.msra.mxu1 %v1064_v51 }
 0x729   :  { %2580 = vmatprep.mubr.msk.f32.mxu0 %vm375_vm13, %v905_v39 }
 0x72c   :  { %2581 = vmatmul.mubr.msk.f32.gmra.mxu0 %vm375_vm13, %v907_v41 }
 0x7af   :  { %v3128_v52 = vpop.f32.mrf.mxu0 }
 0x7b1   :  { %v3130_v54 = vpop.f32.mrf.mxu0 }
 0x7e4   :  { %v3132_v55 = vpop.f32.mrf.mxu0 }
 0x7e6   :  { %v3134_v56 = vpop.f32.mrf.mxu0 }
 0x7e8   :  { %v2579_v57 = vpop.f32.mrf.mxu0 }
 0x7e9   :  { %v1004_v58 = vadd.f32 %v2579_v57, %v3016_v4 }
 0x7ea   :  { %v998_v59 = vpop.f32.mrf.mxu0 }
 0x7eb   :  { %v999_v60 = vadd.f32 %v998_v59, %v3018_v5  ;;  %v1020_v61 = vsel %vm122_vm6, %v1004_v58, -inf }
 0x7ec   :  { %1021 = vmax.xlane.f32.xlu0 %v1020_v61  ;;  %v2582_v62 = vpop.f32.mrf.mxu0 }
 0x7ed   :  { %v1014_v63 = vadd.f32 %v2582_v62, %v3020_v6  ;;  %v1017_v0 = vsel %vm122_vm6, %v999_v60, -inf }
 0x7ee   :  { %1018 = vmax.xlane.f32.xlu1 %v1017_v0  ;;  %v1008_v1 = vpop.f32.mrf.mxu0 }
 0x7ef   :  { %v1009_v2 = vadd.f32 %v1008_v1, %v3022_v7  ;;  %v1026_v3 = vsel %vm122_vm6, %v1014_v63, -inf }
 0x7f1   :  { %v1023_v8 = vsel %vm122_vm6, %v1009_v2, -inf }
 0x7f2   :  { %1027 = vmax.xlane.f32.xlu1 %v1026_v3  ;;  %1024 = vmax.xlane.f32.xlu0 %v1023_v8 }
 0x803   :  { %1184 = vrot.lane.b32.xlu1 %v2973_v48, %s2858_s20 }
 0x808   :  { %1061 = vrot.lane.b32.xlu0 %v2971_v46, %s2857_s19 }
 0x875   :  { %v1022_v9 = vpop.xlane.xlu0 %1021 }
 0x876   :  { %v1030_v10 = vsub.f32 %v1004_v58, %v1022_v9 }
 0x877   :  { %v1019_v11 = vpop.xlane.xlu1 %1018 }
 0x878   :  { %v1035_v12 = vmul.f32 1.442695, %v1030_v10  ;;  %v1029_v13 = vsub.f32 %v999_v60, %v1019_v11 }
 0x87a   :  { %2763 = vpow2.f32 %v1035_v12  ;;  %v1033_v14 = vmul.f32 1.442695, %v1029_v13 }
 0x87b   :  { %v1025_v15 = vpop.xlane.xlu0 %1024  ;;  %v1028_v16 = vpop.xlane.xlu1 %1027 }
 0x87c   :  { %2765 = vpow2.f32 %v1033_v14  ;;  %v1032_v33 = vsub.f32 %v1014_v63, %v1028_v16  ;;  %v1031_v34 = vsub.f32 %v1009_v2, %v1025_v15 }
 0x87e   :  { %v1039_v39 = vmul.f32 1.442695, %v1032_v33  ;;  %v1037_v40 = vmul.f32 1.442695, %v1031_v34 }
 0x87f   :  { %v1062_v17 = vpop.permute.xlu0 %1061  ;;  %v1185_v18 = vpop.permute.xlu1 %1184 }
 0x880   :  { %2589 = vmatprep.subr.mxu1 %v1062_v17  ;;  %2767 = vpow2.f32 %v1039_v39 }
 0x881   :  { %2590 = vmatpush3.msra.mxu1 %v1062_v17  ;;  %2769 = vpow2.f32 %v1037_v40 }
 0x882   :  { %2597 = vmatprep.subr.msk.mxu1 %vm375_vm13, %v1185_v18 }
 0x887   :  { %v2764_v19 = vpop.eup %2763 }
 0x888   :  { %v1044_v20 = vsel %vm122_vm6, %v2764_v19, 0.0 }
 0x889   :  { %v2766_v30 = vpop.eup %2765  ;;  %1045 = vadd.xlane.f32.xlu1 %v1044_v20 }
 0x88a   :  { %v1041_v32 = vsel %vm122_vm6, %v2766_v30, 0.0 }
 0x88b   :  { %1042 = vadd.xlane.f32.xlu0 %v1041_v32 }
 0x88d   :  { %v2768_v41 = vpop.eup %2767 }
 0x88e   :  { %v2770_v42 = vpop.eup %2769  ;;  %v1050_v43 = vsel %vm122_vm6, %v2768_v41, 0.0 }
 0x88f   :  { %v1047_v44 = vsel %vm122_vm6, %v2770_v42, 0.0 }
 0x89a   :  { %1180 = vrot.lane.b32.xlu1 %v2983_v53, %s2858_s20 }
 0x8a1   :  { %1182 = vrot.lane.b32.xlu0 %v2977_v50, %s2858_s20 }
 0x8be   :  { %1051 = vadd.xlane.f32.xlu1 %v1050_v43 }
 0x8c0   :  { %1048 = vadd.xlane.f32.xlu0 %v1047_v44 }
 0x8cf   :  { %1170 = vrot.lane.b32.xlu1 %v2971_v46, %s2859_s21 }
 0x8d3   :  { %1174 = vrot.lane.b32.xlu1 %v2977_v50, %s2859_s21 }
 0x8d6   :  { %1178 = vrot.lane.b32.xlu0 %v2971_v46, %s2858_s20 }
 0x8da   :  { %1172 = vrot.lane.b32.xlu0 %v2983_v53, %s2859_s21 }
 0x8de   :  { %1176 = vrot.lane.b32.xlu0 %v2973_v48, %s2859_s21 }
 0x912   :  { %v1046_v45 = vpop.xlane.xlu1 %1045 }
 0x913   :  { %2771 = vrcp.f32 %v1046_v45 }
 0x914   :  { %v1043_v47 = vpop.xlane.xlu0 %1042 }
 0x915   :  { %2773 = vrcp.f32 %v1043_v47 }
 0x916   :  { %v1181_v60 = vpop.permute.xlu1 %1180 }
 0x918   :  { %v1183_v59 = vpop.permute.xlu0 %1182 }
 0x920   :  { %v2772_v49 = vpop.eup %2771 }
 0x921   :  { %v1058_v58 = vmul.f32 %v2772_v49, %v2764_v19 }
 0x922   :  { %v2774_v51 = vpop.eup %2773 }
 0x923   :  { %v1057_v57 = vmul.f32 %v2774_v51, %v2766_v30 }
 0x925   :  { %2591 = vmatprep.mubr.msk.f32.mxu1 %vm122_vm6, %v1057_v57 }
 0x926   :  { %2592 = vmatmul.mubr.msk.f32.vlgmr.msra.gmra.mxu1 %vm122_vm6, %v1058_v58 }
 0x927   :  { %2598 = vmatpush3.xpose.msk.msra.mxu1 %vm375_vm13, %v1185_v18 }
 0x928   :  { %2599 = vmatprep.subr.msk.mxu1 %vm375_vm13, %v1183_v59 }
 0x92b   :  { %2600 = vmatpush3.xpose.msk.msra.mxu1 %vm375_vm13, %v1183_v59 }
 0x92c   :  { %2601 = vmatprep.subr.msk.mxu1 %vm375_vm13, %v1181_v60 }
 0x92f   :  { %2602 = vmatpush3.xpose.msk.msra.mxu1 %vm375_vm13, %v1181_v60 }
 0x947   :  { %v1052_v61 = vpop.xlane.xlu1 %1051 }
 0x948   :  { %2775 = vrcp.f32 %v1052_v61 }
 0x949   :  { %v1049_v62 = vpop.xlane.xlu0 %1048 }
 0x94a   :  { %2777 = vrcp.f32 %v1049_v62 }
 0x94b   :  { %v1171_v3 = vpop.permute.xlu1 %1170 }
 0x94d   :  { %v1179_v63 = vpop.permute.xlu0 %1178 }
 0x94e   :  { %2603 = vmatprep.subr.msk.mxu1 %vm375_vm13, %v1179_v63 }
 0x94f   :  { %2604 = vmatpush3.xpose.msk.msra.mxu1 %vm375_vm13, %v1179_v63  ;;  %v1175_v10 = vpop.permute.xlu1 %1174 }
 0x951   :  { %v1173_v9 = vpop.permute.xlu0 %1172 }
 0x955   :  { %v2776_v0 = vpop.eup %2775  ;;  %v1177_v11 = vpop.permute.xlu0 %1176 }
 0x956   :  { %v1060_v8 = vmul.f32 %v2776_v0, %v2768_v41 }
 0x957   :  { %v2778_v1 = vpop.eup %2777 }
 0x958   :  { %v1059_v2 = vmul.f32 %v2778_v1, %v2770_v42 }
 0x95a   :  { %2594 = vmatprep.mubr.msk.f32.mxu1 %vm122_vm6, %v1059_v2 }
 0x95b   :  { %2595 = vmatmul.mubr.msk.f32.gmra.mxu1 %vm122_vm6, %v1060_v8 }
 0x95c   :  { %2605 = vmatprep.mubr.msk.f32.mxu1 %vm375_vm13, %v1171_v3 }
 0x95f   :  { %2606 = vmatmul.mubr.msk.f32.vlgmr.msra.gmra.mxu1 %vm375_vm13, %v1173_v9 }
 0x960   :  { %2608 = vmatprep.mubr.msk.f32.mxu1 %vm375_vm13, %v1175_v10 }
 0x963   :  { %2609 = vmatmul.mubr.msk.f32.gmra.mxu1 %vm375_vm13, %v1177_v11 }
 0x9e6   :  { %v3178_v12 = vpop.f32.mrf.mxu1 }
 0x9e8   :  { %v1151_v13 = vpop.f32.mrf.mxu1 }
 0xa1b   :  { %v3180_v14 = vpop.f32.mrf.mxu1 }
 0xa1d   :  { %v1161_v15 = vpop.f32.mrf.mxu1 }
 0xa1f   :  { %v2607_v16 = vpop.f32.mrf.mxu1 }
 0xa20   :  { %v1274_v17 = vadd.f32 %v2607_v16, %v3016_v4  ;;  %v3222_v16 = vld [vmem:[#allocation2 + $0x28] sm:$0xff] }
 0xa21   :  { %v1268_v18 = vpop.f32.mrf.mxu1 }
 0xa22   :  { %v1269_v19 = vadd.f32 %v1268_v18, %v3018_v5  ;;  %v1290_v20 = vsel %vm122_vm6, %v1274_v17, -inf }
 0xa23   :  { %1291 = vmax.xlane.f32.xlu0 %v1290_v20  ;;  %v2610_v30 = vpop.f32.mrf.mxu1 }
 0xa24   :  { %v1284_v32 = vadd.f32 %v2610_v30, %v3020_v6  ;;  %v1287_v33 = vsel %vm122_vm6, %v1269_v19, -inf }
 0xa25   :  { %1288 = vmax.xlane.f32.xlu1 %v1287_v33  ;;  %v1278_v34 = vpop.f32.mrf.mxu1 }
 0xa26   :  { %v1279_v39 = vadd.f32 %v1278_v34, %v3022_v7  ;;  %v1296_v40 = vsel %vm122_vm6, %v1284_v32, -inf }
 0xa28   :  { %v1293_v41 = vsel %vm122_vm6, %v1279_v39, -inf }
 0xa29   :  { %1297 = vmax.xlane.f32.xlu1 %v1296_v40  ;;  %1294 = vmax.xlane.f32.xlu0 %v1293_v41 }
 0xa3a   :  { %1335 = vrot.lane.b32.xlu1 %v2977_v50, %s2860_s22 }
 0xa3f   :  { %1337 = vrot.lane.b32.xlu0 %v2973_v48, %s2860_s22 }
 0xaac   :  { %v1292_v4 = vpop.xlane.xlu0 %1291 }
 0xaad   :  { %v1300_v5 = vsub.f32 %v1274_v17, %v1292_v4  ;;  %v3228_v17 = vld [vmem:[#allocation2 + $0x20] sm:$0xff] }
 0xaae   :  { %v1289_v6 = vpop.xlane.xlu1 %1288 }
 0xaaf   :  { %v1305_v42 = vmul.f32 1.442695, %v1300_v5  ;;  %v1299_v43 = vsub.f32 %v1269_v19, %v1289_v6 }
 0xab1   :  { %2779 = vpow2.f32 %v1305_v42  ;;  %v1303_v7 = vmul.f32 1.442695, %v1299_v43 }
 0xab2   :  { %v1295_v44 = vpop.xlane.xlu0 %1294  ;;  %v1298_v45 = vpop.xlane.xlu1 %1297 }
 0xab3   :  { %2781 = vpow2.f32 %v1303_v7  ;;  %v1301_v47 = vsub.f32 %v1279_v39, %v1295_v44  ;;  %v1302_v49 = vsub.f32 %v1284_v32, %v1298_v45 }
 0xab5   :  { %v1307_v51 = vmul.f32 1.442695, %v1301_v47  ;;  %v1309_v57 = vmul.f32 1.442695, %v1302_v49 }
 0xab6   :  { %v1338_v58 = vpop.permute.xlu0 %1337  ;;  %v1336_v50 = vpop.permute.xlu1 %1335 }
 0xab7   :  { %2783 = vpow2.f32 %v1307_v51  ;;  %2611 = vmatprep.subr.mxu0 %v1338_v58 }
 0xab8   :  { %2785 = vpow2.f32 %v1309_v57  ;;  %2612 = vmatpush3.msra.mxu0 %v1338_v58 }
 0xab9   :  { %2613 = vmatprep.subr.mxu0 %v1336_v50 }
 0xaba   :  { %2614 = vmatpush3.msra.mxu0 %v1336_v50 }
 0xabe   :  { %v2780_v48 = vpop.eup %2779 }
 0xabf   :  { %v1314_v59 = vsel %vm122_vm6, %v2780_v48, 0.0 }
 0xac0   :  { %v2782_v60 = vpop.eup %2781  ;;  %1315 = vadd.xlane.f32.xlu1 %v1314_v59 }
 0xac1   :  { %v1311_v61 = vsel %vm122_vm6, %v2782_v60, 0.0 }
 0xac2   :  { %1312 = vadd.xlane.f32.xlu0 %v1311_v61 }
 0xac4   :  { %v2784_v62 = vpop.eup %2783 }
 0xac5   :  { %v2786_v63 = vpop.eup %2785  ;;  %v1317_v0 = vsel %vm122_vm6, %v2784_v62, 0.0 }
 0xac6   :  { %1318 = vadd.xlane.f32.xlu0 %v1317_v0  ;;  %v1320_v1 = vsel %vm122_vm6, %v2786_v63, 0.0 }
 0xac7   :  { %1321 = vadd.xlane.f32.xlu1 %v1320_v1 }
 0xad8   :  { %1333 = vrot.lane.b32.xlu1 %v2983_v53, %s2860_s22 }
 0xadc   :  { %1444 = vrot.lane.b32.xlu1 %v3130_v54, %s2845_s25  ;;  %1331 = vrot.lane.b32.xlu0 %v2971_v46, %s2860_s22 }
 0xae0   :  { %1460 = vrot.lane.b32.xlu1 %v1151_v13, %s2861_s23  ;;  %1446 = vrot.lane.b32.xlu0 %v3128_v52, %s2845_s25 }
 0xae4   :  { %1448 = vrot.lane.b32.xlu1 %v3134_v56, %s2845_s25  ;;  %1462 = vrot.lane.b32.xlu0 %v3178_v12, %s2861_s23 }
 0xae8   :  { %1464 = vrot.lane.b32.xlu1 %v1161_v15, %s2861_s23  ;;  %1450 = vrot.lane.b32.xlu0 %v3132_v55, %s2845_s25  ;;  %v3218_v15 = vld [vmem:[#allocation2 + $0x30] sm:$0xff] }
 0xaec   :  { %1466 = vrot.lane.b32.xlu0 %v3180_v14, %s2861_s23  ;;  %v3216_v14 = vld [vmem:[#allocation2 + $0x38] sm:$0xff] }
 0xb49   :  { %v1316_v53 = vpop.xlane.xlu1 %1315 }
 0xb4a   :  { %2787 = vrcp.f32 %v1316_v53 }
 0xb4b   :  { %v1313_v54 = vpop.xlane.xlu0 %1312 }
 0xb4c   :  { %2789 = vrcp.f32 %v1313_v54 }
 0xb4f   :  { %v1319_v46 = vpop.xlane.xlu0 %1318 }
 0xb50   :  { %2791 = vrcp.f32 %v1319_v46  ;;  %v1322_v2 = vpop.xlane.xlu1 %1321 }
 0xb51   :  { %2793 = vrcp.f32 %v1322_v2 }
 0xb53   :  { %v1332_v3 = vpop.permute.xlu0 %1331 }
 0xb54   :  { %v1334_v52 = vpop.permute.xlu1 %1333 }
 0xb55   :  { %2615 = vmatprep.subr.mxu0 %v1334_v52 }
 0xb56   :  { %2616 = vmatpush3.msra.mxu0 %v1334_v52 }
 0xb57   :  { %2617 = vmatprep.subr.mxu0 %v1332_v3  ;;  %v2788_v56 = vpop.eup %2787  ;;  %v1447_v32 = vpop.permute.xlu0 %1446 }
 0xb58   :  { %2618 = vmatpush3.msra.mxu0 %v1332_v3  ;;  %v1328_v55 = vmul.f32 %v2788_v56, %v2780_v48  ;;  %v1445_v33 = vpop.permute.xlu1 %1444  ;;  %v1489_v43 = vsel %vm375_vm13, %v3072_v22, %v1447_v32 }
 0xb59   :  { %v2790_v8 = vpop.eup %2789  ;;  %2625 = vmatprep.subr.mxu0 %v3216_v14  ;;  %v1488_v42 = vsel %vm375_vm13, %v3074_v24, %v1445_v33 }
 0xb5a   :  { %v1327_v9 = vmul.f32 %v2790_v8, %v2782_v60 }
 0xb5b   :  { %v1463_v34 = vpop.permute.xlu0 %1462 }
 0xb5c   :  { %2619 = vmatprep.mubr.msk.f32.mxu0 %vm122_vm6, %v1327_v9  ;;  %v1461_v39 = vpop.permute.xlu1 %1460  ;;  %v1494_v45 = vsel %vm1492_vm15, %v1489_v43, %v1463_v34 }
 0xb5d   :  { %v2792_v10 = vpop.eup %2791  ;;  %2620 = vmatmul.mubr.msk.f32.vlgmr.msra.gmra.mxu0 %vm122_vm6, %v1328_v55  ;;  %v1493_v7 = vsel %vm1492_vm15, %v1488_v42, %v1461_v39  ;;  %v1974_v42 = vld [vmem:[%s3364_s2] sm:$0x3]  ;;  %s1801_s2 = sld [smem:[#allocation5]] }
 0xb5e   :  { %v2794_v11 = vpop.eup %2793  ;;  %v1329_v12 = vmul.f32 %v2792_v10, %v2784_v62  ;;  %2626 = vmatpush3.msra.mxu0 %v3216_v14  ;;  %vm1975_vm1 = vcmp.eq.s32.totalorder %v1974_v42, 4294967295 }
 0xb5f   :  { %v1330_v13 = vmul.f32 %v2794_v11, %v2786_v63  ;;  %2627 = vmatprep.subr.mxu0 %v3218_v15  ;;  %v1451_v40 = vpop.permute.xlu0 %1450  ;;  %v1976_v43 = vsel %vm1975_vm1, 21, %v1974_v42 }
 0xb60   :  { %2622 = vmatprep.mubr.msk.f32.mxu0 %vm122_vm6, %v1329_v12  ;;  %2628 = vmatpush3.msra.mxu0 %v3218_v15  ;;  %v1449_v41 = vpop.permute.xlu1 %1448  ;;  %v1491_v22 = vsel %vm375_vm13, %v3076_v27, %v1451_v40 }
 0xb61   :  { %2623 = vmatmul.mubr.msk.f32.gmra.mxu0 %vm122_vm6, %v1330_v13  ;;  %2629 = vmatprep.subr.mxu0 %v3222_v16  ;;  %v1490_v51 = vsel %vm375_vm13, %v3078_v28, %v1449_v41  ;;  %v2333_v28 = vld [vmem:[#allocation2 + $0x81] ss:$0 sm:$0xff]  ;;  %vm2254_vm13 = vcmask 254976  }
 0xb62   :  { %2630 = vmatpush3.msra.mxu0 %v3222_v16 }
 0xb63   :  { %2631 = vmatprep.subr.mxu0 %v3228_v17  ;;  %v1467_v4 = vpop.permute.xlu0 %1466 }
 0xb64   :  { %2632 = vmatpush3.msra.mxu0 %v3228_v17  ;;  %v1465_v5 = vpop.permute.xlu1 %1464  ;;  %v1496_v50 = vsel %vm1492_vm15, %v1491_v22, %v1467_v4 }
 0xb65   :  { %v1495_v24 = vsel %vm1492_vm15, %v1490_v51, %v1465_v5 }
 0xc1d   :  { %v2621_v18 = vpop.f32.mrf.mxu0 }
 0xc1e   :  { %1478 = vrot.lane.b32.xlu0 %v2621_v18, %s2862_s24 }
 0xc1f   :  { %v1421_v19 = vpop.f32.mrf.mxu0 }
 0xc20   :  { %1476 = vrot.lane.b32.xlu1 %v1421_v19, %s2862_s24 }
 0xc21   :  { %v2624_v20 = vpop.f32.mrf.mxu0 }
 0xc22   :  { %1482 = vrot.lane.b32.xlu0 %v2624_v20, %s2862_s24 }
 0xc23   :  { %v1431_v30 = vpop.f32.mrf.mxu0 }
 0xc24   :  { %1480 = vrot.lane.b32.xlu1 %v1431_v30, %s2862_s24 }
 0xc90   :  { %v1479_v6 = vpop.permute.xlu0 %1478 }
 0xc91   :  { %v1499_v49 = vsel %vm1497_vm0, %v1494_v45, %v1479_v6 }
 0xc92   :  { %v1477_v44 = vpop.permute.xlu1 %1476 }
 0xc93   :  { %v1498_v47 = vsel %vm1497_vm0, %v1493_v7, %v1477_v44 }
 0xc94   :  { %2633 = vmatprep.mubr.msk.f32.mxu0 %vm122_vm6, %v1498_v47  ;;  %v1483_v57 = vpop.permute.xlu0 %1482 }
 0xc95   :  { %2634 = vmatmul.mubr.msk.f32.vlgmr.msra.gmra.mxu0 %vm122_vm6, %v1499_v49  ;;  %v1501_v59 = vsel %vm1497_vm0, %v1496_v50, %v1483_v57 }
 0xc96   :  { %v1481_v58 = vpop.permute.xlu1 %1480 }
 0xc97   :  { %v1500_v48 = vsel %vm1497_vm0, %v1495_v24, %v1481_v58 }
 0xc98   :  { %2636 = vmatprep.mubr.msk.f32.mxu0 %vm122_vm6, %v1500_v48 }
 0xc99   :  { %2637 = vmatmul.mubr.msk.f32.gmra.mxu0 %vm122_vm6, %v1501_v59 }
 0xd55   :  { %v2635_v60 = vpop.f32.mrf.mxu0 }
 0xd56   :  { %v1595_v61 = vadd.f32 %v2635_v60, %v2333_v28 }
 0xd57   :  { %v1589_v62 = vpop.f32.mrf.mxu0 }
 0xd58   :  { %v1609_v63 = vadd.f32 %v2951_v35, %v1595_v61  ;;  %v1590_v27 = vadd.f32 %v2333_v28, %v1589_v62 }
 0xd59   :  { %v2638_v0 = vpop.f32.mrf.mxu0 }
 0xd5a   :  { %v1608_v1 = vadd.f32 %v1590_v27, %v2953_v36  ;;  %v1605_v53 = vadd.f32 %v2638_v0, %v2333_v28  ;;  %v1617_v54 = vsel %vm122_vm6, %v1609_v63, 0.0  ;;  %v2338_v0 = vld [vmem:[#allocation2 + $0x82] ss:$0 sm:$0xff] }
 0xd5b   :  { %1618 = vadd.xlane.f32.xlu0 %v1617_v54  ;;  %v1599_v46 = vpop.f32.mrf.mxu0 }
 0xd5c   :  { %v1611_v2 = vadd.f32 %v2957_v37, %v1605_v53  ;;  %v1600_v52 = vadd.f32 %v2333_v28, %v1599_v46  ;;  %v1614_v3 = vsel %vm122_vm6, %v1608_v1, 0.0  ;;  %v2339_v46 = vld [vmem:[#allocation2 + $0x83] ss:$0 sm:$0xff] }
 0xd5d   :  { %1615 = vadd.xlane.f32.xlu1 %v1614_v3 }
 0xd5e   :  { %v1610_v56 = vadd.f32 %v1600_v52, %v2961_v38  ;;  %v1623_v8 = vsel %vm122_vm6, %v1611_v2, 0.0 }
 0xd60   :  { %v1620_v35 = vsel %vm122_vm6, %v1610_v56, 0.0 }
 0xd61   :  { %1624 = vadd.xlane.f32.xlu1 %v1623_v8  ;;  %1621 = vadd.xlane.f32.xlu0 %v1620_v35 }
 0xd72   :  { %1696 = vrot.lane.b32.xlu1 %v3218_v15, %s2850_s1 }
 0xd77   :  { %1698 = vrot.lane.b32.xlu0 %v3216_v14, %s2850_s1 }
 0xde4   :  { %v1619_v36 = vpop.xlane.xlu0 %1618 }
 0xde5   :  { %v1628_v37 = vmul.f32 0.03125, %v1619_v36 }
 0xde6   :  { %v1616_v9 = vpop.xlane.xlu1 %1615 }
 0xde7   :  { %v3264_v55 = vsub.f32 %v1609_v63, %v1628_v37  ;;  %v1627_v10 = vmul.f32 0.03125, %v1616_v9 }
 0xde9   :  { %v3266_v11 = vsub.f32 %v1608_v1, %v1627_v10  ;;  %v1636_v38 = vmul.f32 %v3264_v55, %v3264_v55 }
 0xdea   :  { %v1622_v12 = vpop.xlane.xlu0 %1621  ;;  %v1625_v13 = vpop.xlane.xlu1 %1624 }
 0xdeb   :  { %v1629_v18 = vmul.f32 0.03125, %v1622_v12  ;;  %v1630_v19 = vmul.f32 0.03125, %v1625_v13  ;;  %v1642_v20 = vsel %vm122_vm6, %v1636_v38, 0.0  ;;  %v1635_v30 = vmul.f32 %v3266_v11, %v3266_v11 }
 0xdec   :  { %1643 = vadd.xlane.f32.xlu1 %v1642_v20  ;;  %v1806_v12 = vstv %s1801_s2 }
 0xded   :  { %v3273_v32 = vsub.f32 %v1610_v56, %v1629_v18  ;;  %v3275_v33 = vsub.f32 %v1611_v2, %v1630_v19  ;;  %v1639_v34 = vsel %vm122_vm6, %v1635_v30, 0.0 }
 0xdee   :  { %1640 = vadd.xlane.f32.xlu0 %v1639_v34  ;;  %v1699_v39 = vpop.permute.xlu0 %1698  ;;  %v1697_v40 = vpop.permute.xlu1 %1696 }
 0xdef   :  { %v1637_v41 = vmul.f32 %v3273_v32, %v3273_v32  ;;  %v1638_v4 = vmul.f32 %v3275_v33, %v3275_v33  ;;  %2639 = vmatprep.subr.mxu1 %v1699_v39 }
 0xdf0   :  { %2640 = vmatpush3.msra.mxu1 %v1699_v39 }
 0xdf1   :  { %v1645_v5 = vsel %vm122_vm6, %v1637_v41, 0.0  ;;  %v1648_v6 = vsel %vm122_vm6, %v1638_v4, 0.0  ;;  %2641 = vmatprep.subr.mxu1 %v1697_v40 }
 0xdf2   :  { %1646 = vadd.xlane.f32.xlu0 %v1645_v5  ;;  %1649 = vadd.xlane.f32.xlu1 %v1648_v6 }
 0xdf3   :  { %2642 = vmatpush3.msra.mxu1 %v1697_v40 }
 0xe03   :  { %1694 = vrot.lane.b32.xlu1 %v3222_v16, %s2850_s1 }
 0xe07   :  { %1826 = vrot.lane.b32.xlu1 %v3216_v14, %s2851_s13 }
 0xe08   :  { %1692 = vrot.lane.b32.xlu0 %v3228_v17, %s2850_s1 }
 0xe0b   :  { %1822 = vrot.lane.b32.xlu1 %v3222_v16, %s2851_s13 }
 0xe0c   :  { %1824 = vrot.lane.b32.xlu0 %v3218_v15, %s2851_s13 }
 0xe0f   :  { %1978 = vperm.xlu1 %2730, %v1976_v43   ;;  %v2345_v43 = vld [vmem:[#allocation2 + $0x85] ss:$0 sm:$0xff] }
 0xe10   :  { %1820 = vrot.lane.b32.xlu0 %v3228_v17, %s2851_s13 }
 0xe75   :  { %v1644_v7 = vpop.xlane.xlu1 %1643 }
 0xe76   :  { %v1652_v44 = vmul.f32 0.03125, %v1644_v7 }
 0xe77   :  { %v1641_v45 = vpop.xlane.xlu0 %1640 }
 0xe78   :  { %v1656_v47 = vadd.f32 1e-05, %v1652_v44  ;;  %v1651_v49 = vmul.f32 0.03125, %v1641_v45 }
 0xe7a   :  { %2795 = vrsqrt.f32 %v1656_v47  ;;  %v1655_v51 = vadd.f32 1e-05, %v1651_v49 }
 0xe7b   :  { %v1647_v57 = vpop.xlane.xlu0 %1646  ;;  %v1650_v22 = vpop.xlane.xlu1 %1649 }
 0xe7c   :  { %2797 = vrsqrt.f32 %v1655_v51  ;;  %v1653_v24 = vmul.f32 0.03125, %v1647_v57  ;;  %v1654_v58 = vmul.f32 0.03125, %v1650_v22 }
 0xe7e   :  { %v1657_v50 = vadd.f32 1e-05, %v1653_v24  ;;  %v1658_v48 = vadd.f32 1e-05, %v1654_v58 }
 0xe7f   :  { %v1695_v59 = vpop.permute.xlu1 %1694  ;;  %v1693_v28 = vpop.permute.xlu0 %1692 }
 0xe80   :  { %2799 = vrsqrt.f32 %v1657_v50  ;;  %2643 = vmatprep.subr.mxu1 %v1695_v59 }
 0xe81   :  { %2801 = vrsqrt.f32 %v1658_v48  ;;  %2644 = vmatpush3.msra.mxu1 %v1695_v59 }
 0xe82   :  { %2645 = vmatprep.subr.mxu1 %v1693_v28 }
 0xe83   :  { %v1827_v60 = vpop.permute.xlu1 %1826  ;;  %2646 = vmatpush3.msra.mxu1 %v1693_v28  ;;  %v1825_v61 = vpop.permute.xlu0 %1824 }
 0xe84   :  { %2667 = vmatprep.subr.mxu1 %v2849_v23  ;;  %2653 = vmatprep.subr.mxu0 %v1827_v60 }
 0xe85   :  { %2654 = vmatpush3.msra.mxu0 %v1827_v60 }
 0xe86   :  { %2655 = vmatprep.subr.mxu0 %v1825_v61 }
 0xe87   :  { %v2796_v62 = vpop.eup %2795  ;;  %v1823_v63 = vpop.permute.xlu1 %1822  ;;  %2656 = vmatpush3.msra.mxu0 %v1825_v61 }
 0xe88   :  { %v1664_v27 = vmul.f32 %v2796_v62, %v3264_v55  ;;  %2657 = vmatprep.subr.mxu0 %v1823_v63 }
 0xe89   :  { %v2798_v1 = vpop.eup %2797  ;;  %2658 = vmatpush3.msra.mxu0 %v1823_v63 }
 0xe8a   :  { %v1663_v53 = vmul.f32 %v2798_v1, %v3266_v11  ;;  %v1672_v54 = vmul.f32 %v2338_v0, %v1664_v27  ;;  %v2068_v1 = vld [vmem:[#allocation2 + $0x78] sm:$0xff] }
 0xe8b   :  { %v1979_v55 = vpop.permute.xlu1 %1978 }
 0xe8c   :  { %v1671_v2 = vmul.f32 %v2338_v0, %v1663_v53  ;;  %v3303_v35 = vadd.f32 %v2339_v46, %v1672_v54  ;;  %vm1980_vm2 = vcmp.eq.s32.totalorder %v2921_v21, %v1979_v55  ;;  %v1821_v21 = vpop.permute.xlu0 %1820  ;;  %v2065_v53 = vld [vmem:[#allocation2 + $0x60] sm:$0xff]  ;;  %v2064_v54 = vld [vmem:[#allocation2 + $0x58] sm:$0xff] }
 0xe8d   :  { %v2800_v52 = vpop.eup %2799  ;;  %2659 = vmatprep.subr.mxu0 %v1821_v21 }
 0xe8e   :  { %v2802_v3 = vpop.eup %2801  ;;  %v1679_v56 = vadd.f32 %v2339_v46, %v1671_v2  ;;  %v1665_v8 = vmul.f32 %v2800_v52, %v3273_v32  ;;  %2660 = vmatpush3.msra.mxu0 %v1821_v21  ;;  %v2061_v2 = vld [vmem:[#allocation2 + $0x40] sm:$0xff] }
 0xe8f   :  { %v1666_v36 = vmul.f32 %v2802_v3, %v3275_v33  ;;  %2678 = vmatprep.subr.mxu0 %v2849_v23 }
 0xe90   :  { %2647 = vmatprep.mubr.msk.f32.mxu1 %vm122_vm6, %v1679_v56  ;;  %v1673_v37 = vmul.f32 %v2338_v0, %v1665_v8 }
 0xe91   :  { %2648 = vmatmul.mubr.msk.f32.vlgmr.msra.gmra.mxu1 %vm122_vm6, %v3303_v35  ;;  %v1674_v9 = vmul.f32 %v2338_v0, %v1666_v36 }
 0xe92   :  { %2668 = vmatpush3.msra.mxu1 %v2928_v26  ;;  %v1681_v10 = vadd.f32 %v2339_v46, %v1673_v37  ;;  %v2352_v26 = vsel %vm1980_vm2, 1.0, %v2849_v23 }
 0xe93   :  { %2669 = vmatprep.subr.mxu1 %v2849_v23  ;;  %v1682_v11 = vadd.f32 %v2339_v46, %v1674_v9  ;;  %v2063_v46 = vld [vmem:[#allocation2 + $0x50] sm:$0xff] }
 0xe94   :  { %2670 = vmatpush3.msra.mxu1 %v2925_v25  ;;  %2650 = vmatprep.mubr.msk.f32.mxu1 %vm122_vm6, %v1681_v10  ;;  %v2340_v25 = vld [vmem:[#allocation2 + $0x84] ss:$0 sm:$0xff]  ;;  %v2350_v10 = vld [vmem:[#allocation2 + $0x86] ss:$0 sm:$0xff] }
 0xe95   :  { %2671 = vmatprep.subr.mxu1 %v2849_v23  ;;  %2651 = vmatmul.mubr.msk.f32.gmra.mxu1 %vm122_vm6, %v1682_v11 }
 0xe96   :  { %2672 = vmatpush3.msra.mxu1 %v2934_v29  ;;  %2675 = vmatprep.mubr.msk.f32.mxu1 %vm2863_vm3, %v2849_v23 }
 0xe97   :  { %2673 = vmatprep.subr.mxu1 %v2849_v23 }
 0xe98   :  { %2674 = vmatpush3.msra.mxu1 %v2940_v31 }
 0xe99   :  { %2676 = vmatmul.mubr.msk.f32.vlgmr.msra.gmra.mxu1 %vm122_vm6, %v2352_v26  ;;  %2697 = vmatprep.subr.mxu1 %v2849_v23  ;;  %v2351_v26 = vld [vmem:[#allocation2 + $0x87] ss:$0 sm:$0xff] }
 0xe9a   :  { %2705 = vmatprep.mubr.msk.f32.mxu1 %vm2863_vm3, %v2849_v23 }
 0xf51   :  { %v2649_v29 = vpop.f32.mrf.mxu1 }
 0xf52   :  { %v1788_v38 = vadd.f32 %v2649_v29, %v2340_v25 }
 0xf53   :  { %v1782_v13 = vpop.f32.mrf.mxu1 }
 0xf54   :  { %v1783_v18 = vadd.f32 %v2340_v25, %v1782_v13  ;;  %v1808_v31 = vmul.f32 %v1806_v12, %v1788_v38  ;;  %vm1803_vm4 = vcmp.ge.f32.partialorder %v1788_v38, 0.0 }
 0xf55   :  { %v2652_v19 = vpop.f32.mrf.mxu1 }
 0xf56   :  { %vm1802_vm5 = vcmp.ge.f32.partialorder %v1783_v18, 0.0  ;;  %v1807_v20 = vmul.f32 %v1806_v12, %v1783_v18  ;;  %v1798_v30 = vadd.f32 %v2652_v19, %v2340_v25  ;;  %v1812_v39 = vsel %vm1803_vm4, %v1788_v38, %v1808_v31 }
 0xf57   :  { %v1792_v32 = vpop.f32.mrf.mxu1 }
 0xf58   :  { %v1793_v33 = vadd.f32 %v2340_v25, %v1792_v32  ;;  %v1811_v34 = vsel %vm1802_vm5, %v1783_v18, %v1807_v20  ;;  %v1810_v40 = vmul.f32 %v1806_v12, %v1798_v30  ;;  %vm1805_vm7 = vcmp.ge.f32.partialorder %v1798_v30, 0.0  ;;  %v2354_v32 = vld [vmem:[#allocation2 + $0x88] ss:$0 sm:$0xff] }
 0xf59   :  { %2661 = vmatprep.mubr.msk.f32.mxu0 %vm122_vm6, %v1811_v34  ;;  %v2052_v41 = vpop.f32.mrf.mxu1  ;;  %v2150_v34 = vstv %s2356_s27 }
 0xf5a   :  { %vm1804_vm8 = vcmp.ge.f32.partialorder %v1793_v33, 0.0  ;;  %v1809_v4 = vmul.f32 %v1806_v12, %v1793_v33  ;;  %2662 = vmatmul.mubr.msk.f32.vlgmr.msra.gmra.mxu0 %vm122_vm6, %v1812_v39  ;;  %v1814_v42 = vsel %vm1805_vm7, %v1798_v30, %v1810_v40 }
 0xf5b   :  { %v2677_v5 = vpop.f32.mrf.mxu1  ;;  %2679 = vmatpush3.msra.mxu0 %v2068_v1 }
 0xf5c   :  { %v1813_v6 = vsel %vm1804_vm8, %v1793_v33, %v1809_v4  ;;  %2680 = vmatprep.subr.mxu0 %v2849_v23  ;;  %v2357_v5 = vld [vmem:[#allocation2 + $0x89] ss:$0 sm:$0xff] }
 0xf5d   :  { %2664 = vmatprep.mubr.msk.f32.mxu0 %vm122_vm6, %v1813_v6 }
 0xf5e   :  { %2665 = vmatmul.mubr.msk.f32.gmra.mxu0 %vm122_vm6, %v1814_v42  ;;  %v2245_v42 = vstv %s2359_s28 }
 0xf5f   :  { %2694 = vmatprep.mubr.msk.f32.mxu0 %vm2863_vm3, %v2849_v23 }
0x101a   :  { %v2663_v7 = vpop.f32.mrf.mxu0 }
0x101b   :  { %v1915_v44 = vadd.f32 %v2663_v7, %v2345_v43 }
0x101c   :  { %v1910_v45 = vpop.f32.mrf.mxu0 }
0x101d   :  { %v1927_v47 = vadd.f32 %v1915_v44, %v3303_v35  ;;  %v2360_v44 = vld [vmem:[#allocation2 + $0x8a] ss:$0 sm:$0xff] }
0x101e   :  { %v2666_v49 = vpop.f32.mrf.mxu0 }
0x101f   :  { %v1924_v51 = vadd.f32 %v2666_v49, %v2345_v43  ;;  %v1931_v57 = vsel %vm122_vm6, %v1927_v47, 0.0 }
0x1020   :  { %1932 = vadd.xlane.f32.xlu1 %v1931_v57  ;;  %v1919_v22 = vpop.f32.mrf.mxu0 }
0x1021   :  { %v1928_v24 = vadd.f32 %v1924_v51, %v1682_v11  ;;  %v2259_v51 = vstv %s2361_s4 }
0x1023   :  { %v1934_v58 = vsel %vm122_vm6, %v1928_v24, 0.0 }
0x1024   :  { %1935 = vadd.xlane.f32.xlu0 %v1934_v58 }
0x1031   :  { %2057 = vrot.lane.b32.xlu1 %v2052_v41, %s2848_s3 }
0x1035   :  { %2162 = vrot.lane.b32.xlu1 %v3218_v15, %s2848_s3  ;;  %v2067_v15 = vld [vmem:[#allocation2 + $0x70] sm:$0xff] }
0x1036   :  { %2681 = vmatpush3.msra.mxu0 %v2067_v15 }
0x1037   :  { %2682 = vmatprep.subr.mxu0 %v2849_v23 }
0x1039   :  { %2160 = vrot.lane.b32.xlu1 %v3222_v16, %s2848_s3  ;;  %v2066_v16 = vld [vmem:[#allocation2 + $0x68] sm:$0xff] }
0x103a   :  { %2683 = vmatpush3.msra.mxu0 %v2066_v16 }
0x103b   :  { %2684 = vmatprep.subr.mxu0 %v2849_v23 }
0x103c   :  { %2685 = vmatpush3.msra.mxu0 %v2065_v53 }
0x103d   :  { %2686 = vmatprep.subr.mxu0 %v2849_v23 }
0x103e   :  { %2687 = vmatpush3.msra.mxu0 %v2064_v54 }
0x103f   :  { %2688 = vmatprep.subr.mxu0 %v2849_v23 }
0x1040   :  { %2689 = vmatpush3.msra.mxu0 %v2063_v46 }
0x1041   :  { %2690 = vmatprep.subr.mxu0 %v2849_v23 }
0x10a9   :  { %v1933_v50 = vpop.xlane.xlu1 %1932 }
0x10aa   :  { %v1937_v48 = vmul.f32 0.03125, %v1933_v50 }
0x10ac   :  { %v1939_v60 = vsub.f32 %v1927_v47, %v1937_v48 }
0x10ad   :  { %v1936_v59 = vpop.xlane.xlu0 %1935  ;;  %v2058_v56 = vpop.permute.xlu1 %2057 }
0x10ae   :  { %v1938_v28 = vmul.f32 0.03125, %v1936_v59  ;;  %v1941_v27 = vmul.f32 %v1939_v60, %v1939_v60 }
0x10b0   :  { %v1940_v61 = vsub.f32 %v1928_v24, %v1938_v28  ;;  %v1943_v0 = vsel %vm122_vm6, %v1941_v27, 0.0 }
0x10b1   :  { %v2163_v9 = vpop.permute.xlu1 %2162 }
0x10b2   :  { %v1942_v62 = vmul.f32 %v1940_v61, %v1940_v61 }
0x10b4   :  { %v1946_v63 = vsel %vm122_vm6, %v1942_v62, 0.0 }
0x10b5   :  { %1947 = vadd.xlane.f32.xlu0 %v1946_v63  ;;  %v2161_v20 = vpop.permute.xlu1 %2160 }
0x10b9   :  { %1944 = vadd.xlane.f32.xlu0 %v1943_v0 }
0x10cf   :  { %2164 = vrot.lane.b32.xlu0 %v3216_v14, %s2848_s3  ;;  %v2062_v14 = vld [vmem:[#allocation2 + $0x48] sm:$0xff] }
0x10d0   :  { %2691 = vmatpush3.msra.mxu0 %v2062_v14 }
0x10d1   :  { %2692 = vmatprep.subr.mxu0 %v2849_v23 }
0x10d2   :  { %2693 = vmatpush3.msra.mxu0 %v2061_v2 }
0x10d3   :  { %2158 = vrot.lane.b32.xlu0 %v3228_v17, %s2848_s3 }
0x113e   :  { %v1948_v17 = vpop.xlane.xlu0 %1947 }
0x113f   :  { %v1950_v52 = vmul.f32 0.03125, %v1948_v17 }
0x1141   :  { %v1952_v3 = vadd.f32 1e-05, %v1950_v52 }
0x1142   :  { %v1945_v8 = vpop.xlane.xlu0 %1944 }
0x1143   :  { %2803 = vrsqrt.f32 %v1952_v3  ;;  %v1949_v35 = vmul.f32 0.03125, %v1945_v8 }
0x1145   :  { %v1951_v36 = vadd.f32 1e-05, %v1949_v35 }
0x1146   :  { %v2165_v37 = vpop.permute.xlu0 %2164 }
0x1147   :  { %2805 = vrsqrt.f32 %v1951_v36  ;;  %2698 = vmatpush3.msra.mxu1 %v2165_v37 }
0x1148   :  { %2699 = vmatprep.subr.mxu1 %v2849_v23 }
0x1149   :  { %2700 = vmatpush3.msra.mxu1 %v2163_v9 }
0x114a   :  { %2701 = vmatprep.subr.mxu1 %v2849_v23  ;;  %v2159_v30 = vpop.permute.xlu0 %2158 }
0x114b   :  { %2702 = vmatpush3.msra.mxu1 %v2161_v20 }
0x114c   :  { %2703 = vmatprep.subr.mxu1 %v2849_v23 }
0x114d   :  { %2704 = vmatpush3.msra.mxu1 %v2159_v30 }
0x1150   :  { %v2804_v55 = vpop.eup %2803 }
0x1151   :  { %v1956_v11 = vmul.f32 %v2804_v55, %v1940_v61 }
0x1153   :  { %v1962_v21 = vmul.f32 %v2350_v10, %v1956_v11 }
0x1154   :  { %v2806_v25 = vpop.eup %2805 }
0x1155   :  { %v1955_v29 = vmul.f32 %v2806_v25, %v1939_v60  ;;  %v1968_v38 = vadd.f32 %v2351_v26, %v1962_v21 }
0x1157   :  { %v1961_v12 = vmul.f32 %v2350_v10, %v1955_v29  ;;  %v1970_v18 = vrot.slane %v1968_v38, 7 }
0x1159   :  { %v1967_v13 = vadd.f32 %v2351_v26, %v1961_v12 }
0x115b   :  { %v1973_v31 = vsel %vm1972_vm9, %v1967_v13, %v1970_v18 }
0x115c   :  { %v2060_v19 = vsel %vm122_vm6, %v1973_v31, %v2058_v56 }
0x115d   :  { %2695 = vmatmul.mubr.msk.f32.vlgmr.msra.gmra.mxu0 %vm2074_vm10, %v2060_v19 }
0x121d   :  { %v2144_v33 = vpop.f32.mrf.mxu0 }
0x121e   :  { %v2145_v39 = vadd.f32 %v2354_v32, %v2144_v33 }
0x121f   :  { %v2696_v40 = vpop.f32.mrf.mxu0 }
0x1220   :  { %vm2149_vm11 = vcmp.ge.f32.partialorder %v2145_v39, 0.0  ;;  %v2151_v41 = vmul.f32 %v2150_v34, %v2145_v39 }
0x1222   :  { %v2152_v4 = vsel %vm2149_vm11, %v2145_v39, %v2151_v41 }
0x1223   :  { %2706 = vmatmul.mubr.msk.f32.vlgmr.msra.gmra.mxu1 %vm122_vm6, %v2152_v4 }
0x12e3   :  { %v2239_v6 = vpop.f32.mrf.mxu1 }
0x12e4   :  { %v2240_v43 = vadd.f32 %v2357_v5, %v2239_v6 }
0x12e5   :  { %v2707_v7 = vpop.f32.mrf.mxu1 }
0x12e6   :  { %vm2244_vm12 = vcmp.ge.f32.partialorder %v2240_v43, 0.0  ;;  %v2246_v23 = vmul.f32 %v2245_v42, %v2240_v43 }
0x12e8   :  { %v2247_v45 = vsel %vm2244_vm12, %v2240_v43, %v2246_v23 }
0x12e9   :  { %v2253_v47 = vmul.f32 %v2360_v44, %v2247_v45 }
0x12eb   :  { %v2255_v49 = vsel %vm2254_vm13, %v2253_v47, 0.0 }
0x12ec   :  { %2256 = vadd.xlane.f32.xlu1 %v2255_v49 }
0x1375   :  { %v2257_v57 = vpop.xlane.xlu1 %2256 }
0x1376   :  { %v2260_v22 = vadd.f32 %v2259_v51, %v2257_v57 }
0x1378   :  { %vm2261_vm6 = vcmp.ne.f32.partialorder %v2260_v22, %v2260_v22 }
0x1379   :  { %v2262_v24 = vsel %vm2261_vm6, 0.0, %v2260_v22 }
0x137a   :  { %2264 = vst.msk [vmem:[%s3367_s5] sm:$0x3] %vm2263_vm14, %v2262_v24 }
0x137b   :  { %2269 = vsyncpa [#allocation3], 1 }
0x137c   :  { %2270 = vsyncpa [#allocation4], 1 }

</bundles_post_ra>
